<compile_context>
chip_gen: v7x
topology: tpu7x:2x2x1
jax: 0.10.0
libtpu: 0.0.40
codegen_flags: <defaults>
</compile_context>

<pallas_src>
import jax
import jax.numpy as jnp
from jax.experimental import pallas as pl
from jax.experimental.pallas import tpu as pltpu

BN_EPS = 1e-5
_HAS_BUFFERED = hasattr(pl, "Buffered")


def _round_up(n, m):
    return ((n + m - 1) // m) * m


# --------------------------------------------------------------------------- #
# Kernel
# --------------------------------------------------------------------------- #
def _classifier_kernel(x_ref,
                       w1_ref, b1_ref,      # bottle[0]: D -> H (padded D//4)
                       w2_ref, b2_ref,      # bottle[2]: H -> D
                       w3_ref, b3_ref,      # head[0] with BN folded: D -> D
                       w4_ref, b4_ref,      # head[4]: D -> Cp (padded classes)
                       out_ref, y_ref, f_ref):
    x = x_ref[...]                # (TB, D) f32
    cd = w1_ref.dtype             # compute dtype for MXU operands (bf16 default)

    # ---- bottle: Linear -> ReLU -> Linear ----
    h = jnp.dot(x.astype(cd), w1_ref[...],
                preferred_element_type=jnp.float32) + b1_ref[...]
    h = jnp.maximum(h, 0.0)
    f = jnp.dot(h.astype(cd), w2_ref[...],
                preferred_element_type=jnp.float32) + b2_ref[...]

    # ---- residual (kept in f32) ----
    y = x + f

    # ---- head: Linear(+folded BN) -> ReLU -> [Dropout = identity] -> Linear ----
    z = jnp.dot(y.astype(cd), w3_ref[...],
                preferred_element_type=jnp.float32) + b3_ref[...]
    z = jnp.maximum(z, 0.0)
    out = jnp.dot(z.astype(cd), w4_ref[...],
                  preferred_element_type=jnp.float32) + b4_ref[...]

    out_ref[...] = out.astype(out_ref.dtype)
    y_ref[...] = y.astype(y_ref.dtype)
    f_ref[...] = f.astype(f_ref.dtype)


# --------------------------------------------------------------------------- #
# One-time parameter preparation (hoisted out of the per-call path)
# --------------------------------------------------------------------------- #
def prepare_params(params, *, compute_dtype=jnp.bfloat16):
    """Fold eval-mode BatchNorm1d into head[0], zero-pad narrow dims to full
    128-lane tiles, and cast matmul operands to compute_dtype.  Do this ONCE
    and reuse the result across forward calls."""
    cd = jnp.dtype(compute_dtype)
    D = params["w3"].shape[0]
    C = params["w4"].shape[1]
    H_raw = params["w1"].shape[1]

    # BN fold (in f32):  w3' = w3 * s,  b3' = (b3 - mean) * s + beta
    scale = params["gamma"] / jnp.sqrt(params["running_var"] + BN_EPS)
    w3f = params["w3"] * scale[None, :]
    b3f = (params["b3"] - params["running_mean"]) * scale + params["beta"]

    H = _round_up(max(H_raw, 128), 128)     # bottleneck width padded to 128
    Cp = _round_up(max(C, 128), 128)        # classes padded to 128 (lane-dense)

    return dict(
        _prepared=True, D=D, H=H, Cp=Cp, C=C,
        w1=jnp.pad(params["w1"], ((0, 0), (0, H - H_raw))).astype(cd),
        b1=jnp.pad(params["b1"], (0, H - H_raw)).reshape(1, H).astype(jnp.float32),
        w2=jnp.pad(params["w2"], ((0, H - H_raw), (0, 0))).astype(cd),
        b2=params["b2"].reshape(1, D).astype(jnp.float32),
        w3=w3f.astype(cd),
        b3=b3f.reshape(1, D).astype(jnp.float32),
        w4=jnp.pad(params["w4"], ((0, 0), (0, Cp - C))).astype(cd),
        b4=jnp.pad(params["b4"], (0, Cp - C)).reshape(1, Cp).astype(jnp.float32),
    )


# --------------------------------------------------------------------------- #
# Batch-tile selection
# --------------------------------------------------------------------------- #
def _choose_batch_tile(B8, cap):
    """Pick (TB, B_pad).  Prefer a tile that divides B8 (no hidden pad/slice
    copies) and keep grid >= 2 when B8 >= 16 (use both v7x TensorCores)."""
    cap = max(8, min(cap, B8))
    limit = cap if B8 < 16 else min(cap, max(8, B8 // 2))
    tb = 8
    for t in range(8, limit + 1, 8):
        if B8 % t == 0:
            tb = t
    # If the best divisor tile is badly undersized for a large batch, accept a
    # one-off pad up to a multiple of `cap` (amortized over many grid steps).
    if tb * 4 < cap and B8 > cap:
        return cap, _round_up(B8, cap)
    return tb, B8


# --------------------------------------------------------------------------- #
# Forward wrapper
# --------------------------------------------------------------------------- #
def d_image_classifier_forward(x, params, *, block_b=1024,
                               compute_dtype=jnp.bfloat16,
                               out_dtype=jnp.float32,
                               single_buffer_weights=True,
                               vmem_limit_bytes=None):
    """x: (B, D) float32.  params: raw params (prepared on the fly) or the
    output of prepare_params().  Returns (out, y, f) matching
    dImageClassifier.forward in eval mode.

    block_b default 1024 keeps TB*D f32 activation buffers well inside the
    16 MiB default scoped VMEM of v5e; pass vmem_limit_bytes to go larger."""
    if not params.get("_prepared", False):
        params = prepare_params(params, compute_dtype=compute_dtype)

    x = x.astype(jnp.float32)
    B, D = x.shape
    assert D == params["D"], "feature dim mismatch vs prepared params"
    H, Cp, C = params["H"], params["Cp"], params["C"]

    cap = max(8, (block_b // 8) * 8)
    B8 = _round_up(B, 8)
    TB, B_pad = _choose_batch_tile(B8, cap)
    x_in = jnp.pad(x, ((0, B_pad - B), (0, 0))) if B_pad != B else x
    grid = (B_pad // TB,)

    const = lambda i: (0, 0)    # weights/biases: resident across batch tiles
    batch = lambda i: (i, 0)    # activations: tiled over batch

    def build(single_buffer):
        ck = {}
        if single_buffer and _HAS_BUFFERED:
            ck["pipeline_mode"] = pl.Buffered(1)   # const blocks never re-DMA'd
        in_specs = [
            pl.BlockSpec((TB, D), batch),                                     # x
            pl.BlockSpec((D, H), const, **ck), pl.BlockSpec((1, H), const, **ck),   # w1,b1
            pl.BlockSpec((H, D), const, **ck), pl.BlockSpec((1, D), const, **ck),   # w2,b2
            pl.BlockSpec((D, D), const, **ck), pl.BlockSpec((1, D), const, **ck),   # w3',b3'
            pl.BlockSpec((D, Cp), const, **ck), pl.BlockSpec((1, Cp), const, **ck), # w4,b4
        ]
        out_specs = [
            pl.BlockSpec((TB, Cp), batch),   # out (lane-dense padded classes)
            pl.BlockSpec((TB, D), batch),    # y = x + f
            pl.BlockSpec((TB, D), batch),    # f = bottle(x)
        ]
        cp_kwargs = dict(dimension_semantics=("parallel",))
        if vmem_limit_bytes is not None:
            cp_kwargs["vmem_limit_bytes"] = vmem_limit_bytes
        return pl.pallas_call(
            _classifier_kernel,
            grid_spec=pltpu.PrefetchScalarGridSpec(
                num_scalar_prefetch=0,
                grid=grid,
                in_specs=in_specs,
                out_specs=out_specs,
            ),
            out_shape=(
                jax.ShapeDtypeStruct((B_pad, Cp), out_dtype),
                jax.ShapeDtypeStruct((B_pad, D), out_dtype),
                jax.ShapeDtypeStruct((B_pad, D), out_dtype),
            ),
            compiler_params=pltpu.CompilerParams(**cp_kwargs),
        )

    args = (x_in, params["w1"], params["b1"], params["w2"], params["b2"],
            params["w3"], params["b3"], params["w4"], params["b4"])
    try:
        out_p, y_p, f_p = build(single_buffer_weights)(*args)
    except Exception:
        if not (single_buffer_weights and _HAS_BUFFERED):
            raise
        # TODO(synk): drop this fallback once pl.Buffered(1) is guaranteed on all
        # deployed jax versions; it only costs the wasted double-buffer VMEM.
        out_p, y_p, f_p = build(False)(*args)

    out = out_p[:B, :C]
    y = y_p[:B] if B_pad != B else y_p
    f = f_p[:B] if B_pad != B else f_p
    return out, y, f


# --------------------------------------------------------------------------- #
# Init + references
# --------------------------------------------------------------------------- #
def init_params(key, num_classes, bottle_dim=256, if_zero=True):
    """Deterministic init matching dImageClassifier.__init__ (if_drop=True),
    weights stored pre-transposed as (in, out).  Includes BN running stats."""
    D = bottle_dim
    D4 = bottle_dim // 4
    k1, k2, k3, k4, k5 = jax.random.split(key, 5)

    w1 = 0.005 * jax.random.normal(k1, (D, D4), jnp.float32)
    b1 = jnp.full((D4,), 0.1, jnp.float32)
    if if_zero:
        w2 = jnp.zeros((D4, D), jnp.float32)
        b2 = jnp.zeros((D,), jnp.float32)
    else:
        w2 = 0.005 * jax.random.normal(k2, (D4, D), jnp.float32)
        b2 = jnp.full((D,), 0.1, jnp.float32)
    w3 = 0.01 * jax.random.normal(k3, (D, D), jnp.float32)
    b3 = jnp.full((D,), 0.05, jnp.float32)
    gamma = 0.01 * jax.random.normal(k4, (D,), jnp.float32)
    beta = jnp.zeros((D,), jnp.float32)
    running_mean = jnp.zeros((D,), jnp.float32)
    running_var = jnp.ones((D,), jnp.float32)
    w4 = 0.01 * jax.random.normal(k5, (D, num_classes), jnp.float32)
    b4 = jnp.zeros((num_classes,), jnp.float32)

    return dict(w1=w1, b1=b1, w2=w2, b2=b2, w3=w3, b3=b3,
                gamma=gamma, beta=beta,
                running_mean=running_mean, running_var=running_var,
                w4=w4, b4=b4)


def reference_forward_exact(x, p):
    """PyTorch-module semantics in f32 (explicit BN, eval mode)."""
    h = jnp.maximum(x @ p["w1"] + p["b1"], 0.0)
    f = h @ p["w2"] + p["b2"]
    y = x + f
    z = y @ p["w3"] + p["b3"]
    inv_std = 1.0 / jnp.sqrt(p["running_var"] + BN_EPS)
    z = p["gamma"] * (z - p["running_mean"]) * inv_std + p["beta"]
    z = jnp.maximum(z, 0.0)
    out = z @ p["w4"] + p["b4"]
    return out, y, f


def reference_forward_compute(x, p, compute_dtype):
    """Mirrors the kernel numerics: BN folded in f32, matmul operands cast to
    compute_dtype, f32 accumulation, f32 epilogue."""
    cd = jnp.dtype(compute_dtype)
    scale = p["gamma"] / jnp.sqrt(p["running_var"] + BN_EPS)
    w3f = (p["w3"] * scale[None, :]).astype(cd)
    b3f = (p["b3"] - p["running_mean"]) * scale + p["beta"]
    h = jnp.dot(x.astype(cd), p["w1"].astype(cd),
                preferred_element_type=jnp.float32) + p["b1"]
    h = jnp.maximum(h, 0.0)
    f = jnp.dot(h.astype(cd), p["w2"].astype(cd),
                preferred_element_type=jnp.float32) + p["b2"]
    y = x + f
    z = jnp.dot(y.astype(cd), w3f, preferred_element_type=jnp.float32) + b3f
    z = jnp.maximum(z, 0.0)
    out = jnp.dot(z.astype(cd), p["w4"].astype(cd),
                  preferred_element_type=jnp.float32) + p["b4"]
    return out, y, f


if __name__ == "__main__":
    D = 256          # bottle_dim (module default)
    NUM_CLASSES = 16

    key = jax.random.PRNGKey(0)
    k_x, k_p, k_p2 = jax.random.split(key, 3)

    # ---- check 1: module defaults (if_zero=True), exact f32 path, grid=(1,) ----
    params = init_params(k_p, NUM_CLASSES, bottle_dim=D, if_zero=True)
    prepared_f32 = prepare_params(params, compute_dtype=jnp.float32)
    x = jax.random.normal(k_x, (8, D), jnp.float32)

    out, y, f = d_image_classifier_forward(x, prepared_f32)
    jax.block_until_ready((out, y, f))
    assert out.shape == (8, NUM_CLASSES) and y.shape == (8, D) and f.shape == (8, D)

    out_r, y_r, f_r = reference_forward_exact(x, params)
    assert jnp.allclose(out, out_r, atol=1e-4), "out mismatch (f32)"
    assert jnp.allclose(y, y_r, atol=1e-5), "residual mismatch (f32)"
    assert jnp.allclose(f, f_r, atol=1e-5), "bottle mismatch (f32)"

    # ---- check 2: if_zero=False, default bf16 weights, multi-tile batch grid ----
    params2 = init_params(k_p2, NUM_CLASSES, bottle_dim=D, if_zero=False)
    prepared_bf16 = prepare_params(params2)          # compute_dtype defaults to bf16
    x2 = jax.random.normal(jax.random.PRNGKey(1), (24, D), jnp.float32)

    out2, y2, f2 = d_image_classifier_forward(x2, prepared_bf16)   # TB=8, grid=(3,)
    jax.block_until_ready((out2, y2, f2))
    assert out2.shape == (24, NUM_CLASSES)

    out2_r, y2_r, f2_r = reference_forward_compute(x2, params2, jnp.bfloat16)
    assert jnp.allclose(out2, out2_r, atol=2e-3, rtol=2e-2), "out mismatch (bf16)"
    assert jnp.allclose(y2, y2_r, atol=2e-3, rtol=2e-2), "residual mismatch (bf16)"
    assert jnp.allclose(f2, f2_r, atol=2e-3, rtol=2e-2), "bottle mismatch (bf16)"

    print("KERNEL_OK")
</pallas_src>

<mosaic_0001>
module attributes {stable_mosaic.version = 11 : i64} {
  func.func @_classifier_kernel(%arg0: i32, %arg1: memref<8x256xf32, #tpu.memory_space<vmem>>, %arg2: memref<256x128xf32, #tpu.memory_space<vmem>>, %arg3: memref<1x128xf32, #tpu.memory_space<vmem>>, %arg4: memref<128x256xf32, #tpu.memory_space<vmem>>, %arg5: memref<1x256xf32, #tpu.memory_space<vmem>>, %arg6: memref<256x256xf32, #tpu.memory_space<vmem>>, %arg7: memref<1x256xf32, #tpu.memory_space<vmem>>, %arg8: memref<256x128xf32, #tpu.memory_space<vmem>>, %arg9: memref<1x128xf32, #tpu.memory_space<vmem>>, %arg10: memref<8x128xf32, #tpu.memory_space<vmem>>, %arg11: memref<8x256xf32, #tpu.memory_space<vmem>>, %arg12: memref<8x256xf32, #tpu.memory_space<vmem>>) attributes {dimension_semantics = [#tpu.dimension_semantics<parallel>], iteration_bounds = array<i64: 1>, scalar_prefetch = 0 : i64, scratch_operands = 0 : i64, tpu.core_type = #tpu.core_type<tc>, window_params = [{transform_indices = @transform_0, window_bounds = array<i64: 8, 256>}, {pipeline_mode = #tpu.pipeline_mode<synchronous>, transform_indices = @transform_1, window_bounds = array<i64: 256, 128>}, {pipeline_mode = #tpu.pipeline_mode<synchronous>, transform_indices = @transform_2, window_bounds = array<i64: 1, 128>}, {pipeline_mode = #tpu.pipeline_mode<synchronous>, transform_indices = @transform_3, window_bounds = array<i64: 128, 256>}, {pipeline_mode = #tpu.pipeline_mode<synchronous>, transform_indices = @transform_4, window_bounds = array<i64: 1, 256>}, {pipeline_mode = #tpu.pipeline_mode<synchronous>, transform_indices = @transform_5, window_bounds = array<i64: 256, 256>}, {pipeline_mode = #tpu.pipeline_mode<synchronous>, transform_indices = @transform_6, window_bounds = array<i64: 1, 256>}, {pipeline_mode = #tpu.pipeline_mode<synchronous>, transform_indices = @transform_7, window_bounds = array<i64: 256, 128>}, {pipeline_mode = #tpu.pipeline_mode<synchronous>, transform_indices = @transform_8, window_bounds = array<i64: 1, 128>}, {transform_indices = @transform_9, window_bounds = array<i64: 8, 128>}, {transform_indices = @transform_10, window_bounds = array<i64: 8, 256>}, {transform_indices = @transform_11, window_bounds = array<i64: 8, 256>}]} {
    %c0 = arith.constant 0 : index
    %c0_0 = arith.constant 0 : index
    %0 = vector.load %arg1[%c0, %c0_0] : memref<8x256xf32, #tpu.memory_space<vmem>>, vector<8x256xf32>
    %c0_1 = arith.constant 0 : index
    %c0_2 = arith.constant 0 : index
    %1 = vector.load %arg2[%c0_1, %c0_2] : memref<256x128xf32, #tpu.memory_space<vmem>>, vector<256x128xf32>
    %cst = arith.constant dense<0.000000e+00> : vector<8x128xf32>
    %2 = tpu.matmul %0, %1, %cst {dimension_numbers = #tpu.dot_dimension_numbers<[1], [0], [0], [1], [0, 0, 1, 1], [], []>} : vector<8x256xf32>, vector<256x128xf32>, vector<8x128xf32> -> vector<8x128xf32>
    %c0_3 = arith.constant 0 : index
    %c0_4 = arith.constant 0 : index
    %3 = vector.load %arg3[%c0_3, %c0_4] : memref<1x128xf32, #tpu.memory_space<vmem>>, vector<1x128xf32>
    %4 = vector.broadcast %3 : vector<1x128xf32> to vector<8x128xf32>
    %5 = arith.addf %2, %4 : vector<8x128xf32>
    %cst_5 = arith.constant 0.000000e+00 : f32
    %6 = vector.broadcast %cst_5 : f32 to vector<8x128xf32>
    %7 = arith.maximumf %5, %6 : vector<8x128xf32>
    %c0_6 = arith.constant 0 : index
    %c0_7 = arith.constant 0 : index
    %8 = vector.load %arg4[%c0_6, %c0_7] : memref<128x256xf32, #tpu.memory_space<vmem>>, vector<128x256xf32>
    %cst_8 = arith.constant dense<0.000000e+00> : vector<8x256xf32>
    %9 = tpu.matmul %7, %8, %cst_8 {dimension_numbers = #tpu.dot_dimension_numbers<[1], [0], [0], [1], [0, 0, 1, 1], [], []>} : vector<8x128xf32>, vector<128x256xf32>, vector<8x256xf32> -> vector<8x256xf32>
    %c0_9 = arith.constant 0 : index
    %c0_10 = arith.constant 0 : index
    %10 = vector.load %arg5[%c0_9, %c0_10] : memref<1x256xf32, #tpu.memory_space<vmem>>, vector<1x256xf32>
    %11 = vector.broadcast %10 : vector<1x256xf32> to vector<8x256xf32>
    %12 = arith.addf %9, %11 : vector<8x256xf32>
    %13 = arith.addf %0, %12 : vector<8x256xf32>
    %c0_11 = arith.constant 0 : index
    %c0_12 = arith.constant 0 : index
    %14 = vector.load %arg6[%c0_11, %c0_12] : memref<256x256xf32, #tpu.memory_space<vmem>>, vector<256x256xf32>
    %cst_13 = arith.constant dense<0.000000e+00> : vector<8x256xf32>
    %15 = tpu.matmul %13, %14, %cst_13 {dimension_numbers = #tpu.dot_dimension_numbers<[1], [0], [0], [1], [0, 0, 1, 1], [], []>} : vector<8x256xf32>, vector<256x256xf32>, vector<8x256xf32> -> vector<8x256xf32>
    %c0_14 = arith.constant 0 : index
    %c0_15 = arith.constant 0 : index
    %16 = vector.load %arg7[%c0_14, %c0_15] : memref<1x256xf32, #tpu.memory_space<vmem>>, vector<1x256xf32>
    %17 = vector.broadcast %16 : vector<1x256xf32> to vector<8x256xf32>
    %18 = arith.addf %15, %17 : vector<8x256xf32>
    %cst_16 = arith.constant 0.000000e+00 : f32
    %19 = vector.broadcast %cst_16 : f32 to vector<8x256xf32>
    %20 = arith.maximumf %18, %19 : vector<8x256xf32>
    %c0_17 = arith.constant 0 : index
    %c0_18 = arith.constant 0 : index
    %21 = vector.load %arg8[%c0_17, %c0_18] : memref<256x128xf32, #tpu.memory_space<vmem>>, vector<256x128xf32>
    %cst_19 = arith.constant dense<0.000000e+00> : vector<8x128xf32>
    %22 = tpu.matmul %20, %21, %cst_19 {dimension_numbers = #tpu.dot_dimension_numbers<[1], [0], [0], [1], [0, 0, 1, 1], [], []>} : vector<8x256xf32>, vector<256x128xf32>, vector<8x128xf32> -> vector<8x128xf32>
    %c0_20 = arith.constant 0 : index
    %c0_21 = arith.constant 0 : index
    %23 = vector.load %arg9[%c0_20, %c0_21] : memref<1x128xf32, #tpu.memory_space<vmem>>, vector<1x128xf32>
    %24 = vector.broadcast %23 : vector<1x128xf32> to vector<8x128xf32>
    %25 = arith.addf %22, %24 : vector<8x128xf32>
    %c0_22 = arith.constant 0 : index
    %c0_23 = arith.constant 0 : index
    %26 = vector.load %arg10[%c0_22, %c0_23] : memref<8x128xf32, #tpu.memory_space<vmem>>, vector<8x128xf32>
    tpu.vector_store %arg10[%c0_22, %c0_23], %25 {strides = array<i32>} : memref<8x128xf32, #tpu.memory_space<vmem>>, vector<8x128xf32>,
    %c0_24 = arith.constant 0 : index
    %c0_25 = arith.constant 0 : index
    %27 = vector.load %arg11[%c0_24, %c0_25] : memref<8x256xf32, #tpu.memory_space<vmem>>, vector<8x256xf32>
    tpu.vector_store %arg11[%c0_24, %c0_25], %13 {strides = array<i32>} : memref<8x256xf32, #tpu.memory_space<vmem>>, vector<8x256xf32>,
    %c0_26 = arith.constant 0 : index
    %c0_27 = arith.constant 0 : index
    %28 = vector.load %arg12[%c0_26, %c0_27] : memref<8x256xf32, #tpu.memory_space<vmem>>, vector<8x256xf32>
    tpu.vector_store %arg12[%c0_26, %c0_27], %12 {strides = array<i32>} : memref<8x256xf32, #tpu.memory_space<vmem>>, vector<8x256xf32>,
    return
  }
  func.func @transform_0(%arg0: i32) -> (i32, i32) {
    %c0_i32 = arith.constant 0 : i32
    %c0_i32_0 = arith.constant 0 : i32
    return %arg0, %c0_i32 : i32, i32
  }
  func.func @transform_1(%arg0: i32) -> (i32, i32) {
    %c0_i32 = arith.constant 0 : i32
    %c0_i32_0 = arith.constant 0 : i32
    %c0_i32_1 = arith.constant 0 : i32
    return %c0_i32, %c0_i32_0 : i32, i32
  }
  func.func @transform_2(%arg0: i32) -> (i32, i32) {
    %c0_i32 = arith.constant 0 : i32
    %c0_i32_0 = arith.constant 0 : i32
    %c0_i32_1 = arith.constant 0 : i32
    return %c0_i32, %c0_i32_0 : i32, i32
  }
  func.func @transform_3(%arg0: i32) -> (i32, i32) {
    %c0_i32 = arith.constant 0 : i32
    %c0_i32_0 = arith.constant 0 : i32
    %c0_i32_1 = arith.constant 0 : i32
    return %c0_i32, %c0_i32_0 : i32, i32
  }
  func.func @transform_4(%arg0: i32) -> (i32, i32) {
    %c0_i32 = arith.constant 0 : i32
    %c0_i32_0 = arith.constant 0 : i32
    %c0_i32_1 = arith.constant 0 : i32
    return %c0_i32, %c0_i32_0 : i32, i32
  }
  func.func @transform_5(%arg0: i32) -> (i32, i32) {
    %c0_i32 = arith.constant 0 : i32
    %c0_i32_0 = arith.constant 0 : i32
    %c0_i32_1 = arith.constant 0 : i32
    return %c0_i32, %c0_i32_0 : i32, i32
  }
  func.func @transform_6(%arg0: i32) -> (i32, i32) {
    %c0_i32 = arith.constant 0 : i32
    %c0_i32_0 = arith.constant 0 : i32
    %c0_i32_1 = arith.constant 0 : i32
    return %c0_i32, %c0_i32_0 : i32, i32
  }
  func.func @transform_7(%arg0: i32) -> (i32, i32) {
    %c0_i32 = arith.constant 0 : i32
    %c0_i32_0 = arith.constant 0 : i32
    %c0_i32_1 = arith.constant 0 : i32
    return %c0_i32, %c0_i32_0 : i32, i32
  }
  func.func @transform_8(%arg0: i32) -> (i32, i32) {
    %c0_i32 = arith.constant 0 : i32
    %c0_i32_0 = arith.constant 0 : i32
    %c0_i32_1 = arith.constant 0 : i32
    return %c0_i32, %c0_i32_0 : i32, i32
  }
  func.func @transform_9(%arg0: i32) -> (i32, i32) {
    %c0_i32 = arith.constant 0 : i32
    %c0_i32_0 = arith.constant 0 : i32
    return %arg0, %c0_i32 : i32, i32
  }
  func.func @transform_10(%arg0: i32) -> (i32, i32) {
    %c0_i32 = arith.constant 0 : i32
    %c0_i32_0 = arith.constant 0 : i32
    return %arg0, %c0_i32 : i32, i32
  }
  func.func @transform_11(%arg0: i32) -> (i32, i32) {
    %c0_i32 = arith.constant 0 : i32
    %c0_i32_0 = arith.constant 0 : i32
    return %arg0, %c0_i32 : i32, i32
  }
}

module attributes {stable_mosaic.version = 11 : i64} {
  func.func @_classifier_kernel(%arg0: i32, %arg1: memref<8x256xf32, #tpu.memory_space<vmem>>, %arg2: memref<256x128xf32, #tpu.memory_space<vmem>>, %arg3: memref<1x128xf32, #tpu.memory_space<vmem>>, %arg4: memref<128x256xf32, #tpu.memory_space<vmem>>, %arg5: memref<1x256xf32, #tpu.memory_space<vmem>>, %arg6: memref<256x256xf32, #tpu.memory_space<vmem>>, %arg7: memref<1x256xf32, #tpu.memory_space<vmem>>, %arg8: memref<256x128xf32, #tpu.memory_space<vmem>>, %arg9: memref<1x128xf32, #tpu.memory_space<vmem>>, %arg10: memref<8x128xf32, #tpu.memory_space<vmem>>, %arg11: memref<8x256xf32, #tpu.memory_space<vmem>>, %arg12: memref<8x256xf32, #tpu.memory_space<vmem>>) attributes {dimension_semantics = [#tpu.dimension_semantics<parallel>], iteration_bounds = array<i64: 1>, scalar_prefetch = 0 : i64, scratch_operands = 0 : i64, tpu.core_type = #tpu.core_type<tc>, window_params = [{transform_indices = @transform_0, window_bounds = array<i64: 8, 256>}, {pipeline_mode = #tpu.pipeline_mode<synchronous>, transform_indices = @transform_1, window_bounds = array<i64: 256, 128>}, {pipeline_mode = #tpu.pipeline_mode<synchronous>, transform_indices = @transform_2, window_bounds = array<i64: 1, 128>}, {pipeline_mode = #tpu.pipeline_mode<synchronous>, transform_indices = @transform_3, window_bounds = array<i64: 128, 256>}, {pipeline_mode = #tpu.pipeline_mode<synchronous>, transform_indices = @transform_4, window_bounds = array<i64: 1, 256>}, {pipeline_mode = #tpu.pipeline_mode<synchronous>, transform_indices = @transform_5, window_bounds = array<i64: 256, 256>}, {pipeline_mode = #tpu.pipeline_mode<synchronous>, transform_indices = @transform_6, window_bounds = array<i64: 1, 256>}, {pipeline_mode = #tpu.pipeline_mode<synchronous>, transform_indices = @transform_7, window_bounds = array<i64: 256, 128>}, {pipeline_mode = #tpu.pipeline_mode<synchronous>, transform_indices = @transform_8, window_bounds = array<i64: 1, 128>}, {transform_indices = @transform_9, window_bounds = array<i64: 8, 128>}, {transform_indices = @transform_10, window_bounds = array<i64: 8, 256>}, {transform_indices = @transform_11, window_bounds = array<i64: 8, 256>}]} {
    %c0 = arith.constant 0 : index
    %c0_0 = arith.constant 0 : index
    %0 = vector.load %arg1[%c0, %c0_0] : memref<8x256xf32, #tpu.memory_space<vmem>>, vector<8x256xf32>
    %c0_1 = arith.constant 0 : index
    %c0_2 = arith.constant 0 : index
    %1 = vector.load %arg2[%c0_1, %c0_2] : memref<256x128xf32, #tpu.memory_space<vmem>>, vector<256x128xf32>
    %cst = arith.constant dense<0.000000e+00> : vector<8x128xf32>
    %2 = tpu.matmul %0, %1, %cst {dimension_numbers = #tpu.dot_dimension_numbers<[1], [0], [0], [1], [0, 0, 1, 1], [], []>} : vector<8x256xf32>, vector<256x128xf32>, vector<8x128xf32> -> vector<8x128xf32>
    %c0_3 = arith.constant 0 : index
    %c0_4 = arith.constant 0 : index
    %3 = vector.load %arg3[%c0_3, %c0_4] : memref<1x128xf32, #tpu.memory_space<vmem>>, vector<1x128xf32>
    %4 = vector.broadcast %3 : vector<1x128xf32> to vector<8x128xf32>
    %5 = arith.addf %2, %4 : vector<8x128xf32>
    %cst_5 = arith.constant 0.000000e+00 : f32
    %6 = vector.broadcast %cst_5 : f32 to vector<8x128xf32>
    %7 = arith.maximumf %5, %6 : vector<8x128xf32>
    %c0_6 = arith.constant 0 : index
    %c0_7 = arith.constant 0 : index
    %8 = vector.load %arg4[%c0_6, %c0_7] : memref<128x256xf32, #tpu.memory_space<vmem>>, vector<128x256xf32>
    %cst_8 = arith.constant dense<0.000000e+00> : vector<8x256xf32>
    %9 = tpu.matmul %7, %8, %cst_8 {dimension_numbers = #tpu.dot_dimension_numbers<[1], [0], [0], [1], [0, 0, 1, 1], [], []>} : vector<8x128xf32>, vector<128x256xf32>, vector<8x256xf32> -> vector<8x256xf32>
    %c0_9 = arith.constant 0 : index
    %c0_10 = arith.constant 0 : index
    %10 = vector.load %arg5[%c0_9, %c0_10] : memref<1x256xf32, #tpu.memory_space<vmem>>, vector<1x256xf32>
    %11 = vector.broadcast %10 : vector<1x256xf32> to vector<8x256xf32>
    %12 = arith.addf %9, %11 : vector<8x256xf32>
    %13 = arith.addf %0, %12 : vector<8x256xf32>
    %c0_11 = arith.constant 0 : index
    %c0_12 = arith.constant 0 : index
    %14 = vector.load %arg6[%c0_11, %c0_12] : memref<256x256xf32, #tpu.memory_space<vmem>>, vector<256x256xf32>
    %cst_13 = arith.constant dense<0.000000e+00> : vector<8x256xf32>
    %15 = tpu.matmul %13, %14, %cst_13 {dimension_numbers = #tpu.dot_dimension_numbers<[1], [0], [0], [1], [0, 0, 1, 1], [], []>} : vector<8x256xf32>, vector<256x256xf32>, vector<8x256xf32> -> vector<8x256xf32>
    %c0_14 = arith.constant 0 : index
    %c0_15 = arith.constant 0 : index
    %16 = vector.load %arg7[%c0_14, %c0_15] : memref<1x256xf32, #tpu.memory_space<vmem>>, vector<1x256xf32>
    %17 = vector.broadcast %16 : vector<1x256xf32> to vector<8x256xf32>
    %18 = arith.addf %15, %17 : vector<8x256xf32>
    %cst_16 = arith.constant 0.000000e+00 : f32
    %19 = vector.broadcast %cst_16 : f32 to vector<8x256xf32>
    %20 = arith.maximumf %18, %19 : vector<8x256xf32>
    %c0_17 = arith.constant 0 : index
    %c0_18 = arith.constant 0 : index
    %21 = vector.load %arg8[%c0_17, %c0_18] : memref<256x128xf32, #tpu.memory_space<vmem>>, vector<256x128xf32>
    %cst_19 = arith.constant dense<0.000000e+00> : vector<8x128xf32>
    %22 = tpu.matmul %20, %21, %cst_19 {dimension_numbers = #tpu.dot_dimension_numbers<[1], [0], [0], [1], [0, 0, 1, 1], [], []>} : vector<8x256xf32>, vector<256x128xf32>, vector<8x128xf32> -> vector<8x128xf32>
    %c0_20 = arith.constant 0 : index
    %c0_21 = arith.constant 0 : index
    %23 = vector.load %arg9[%c0_20, %c0_21] : memref<1x128xf32, #tpu.memory_space<vmem>>, vector<1x128xf32>
    %24 = vector.broadcast %23 : vector<1x128xf32> to vector<8x128xf32>
    %25 = arith.addf %22, %24 : vector<8x128xf32>
    %c0_22 = arith.constant 0 : index
    %c0_23 = arith.constant 0 : index
    %26 = vector.load %arg10[%c0_22, %c0_23] : memref<8x128xf32, #tpu.memory_space<vmem>>, vector<8x128xf32>
    tpu.vector_store %arg10[%c0_22, %c0_23], %25 {strides = array<i32>} : memref<8x128xf32, #tpu.memory_space<vmem>>, vector<8x128xf32>,
    %c0_24 = arith.constant 0 : index
    %c0_25 = arith.constant 0 : index
    %27 = vector.load %arg11[%c0_24, %c0_25] : memref<8x256xf32, #tpu.memory_space<vmem>>, vector<8x256xf32>
    tpu.vector_store %arg11[%c0_24, %c0_25], %13 {strides = array<i32>} : memref<8x256xf32, #tpu.memory_space<vmem>>, vector<8x256xf32>,
    %c0_26 = arith.constant 0 : index
    %c0_27 = arith.constant 0 : index
    %28 = vector.load %arg12[%c0_26, %c0_27] : memref<8x256xf32, #tpu.memory_space<vmem>>, vector<8x256xf32>
    tpu.vector_store %arg12[%c0_26, %c0_27], %12 {strides = array<i32>} : memref<8x256xf32, #tpu.memory_space<vmem>>, vector<8x256xf32>,
    return
  }
  func.func @transform_0(%arg0: i32) -> (i32, i32) {
    %c0_i32 = arith.constant 0 : i32
    %c0_i32_0 = arith.constant 0 : i32
    return %arg0, %c0_i32 : i32, i32
  }
  func.func @transform_1(%arg0: i32) -> (i32, i32) {
    %c0_i32 = arith.constant 0 : i32
    %c0_i32_0 = arith.constant 0 : i32
    %c0_i32_1 = arith.constant 0 : i32
    return %c0_i32, %c0_i32_0 : i32, i32
  }
  func.func @transform_2(%arg0: i32) -> (i32, i32) {
    %c0_i32 = arith.constant 0 : i32
    %c0_i32_0 = arith.constant 0 : i32
    %c0_i32_1 = arith.constant 0 : i32
    return %c0_i32, %c0_i32_0 : i32, i32
  }
  func.func @transform_3(%arg0: i32) -> (i32, i32) {
    %c0_i32 = arith.constant 0 : i32
    %c0_i32_0 = arith.constant 0 : i32
    %c0_i32_1 = arith.constant 0 : i32
    return %c0_i32, %c0_i32_0 : i32, i32
  }
  func.func @transform_4(%arg0: i32) -> (i32, i32) {
    %c0_i32 = arith.constant 0 : i32
    %c0_i32_0 = arith.constant 0 : i32
    %c0_i32_1 = arith.constant 0 : i32
    return %c0_i32, %c0_i32_0 : i32, i32
  }
  func.func @transform_5(%arg0: i32) -> (i32, i32) {
    %c0_i32 = arith.constant 0 : i32
    %c0_i32_0 = arith.constant 0 : i32
    %c0_i32_1 = arith.constant 0 : i32
    return %c0_i32, %c0_i32_0 : i32, i32
  }
  func.func @transform_6(%arg0: i32) -> (i32, i32) {
    %c0_i32 = arith.constant 0 : i32
    %c0_i32_0 = arith.constant 0 : i32
    %c0_i32_1 = arith.constant 0 : i32
    return %c0_i32, %c0_i32_0 : i32, i32
  }
  func.func @transform_7(%arg0: i32) -> (i32, i32) {
    %c0_i32 = arith.constant 0 : i32
    %c0_i32_0 = arith.constant 0 : i32
    %c0_i32_1 = arith.constant 0 : i32
    return %c0_i32, %c0_i32_0 : i32, i32
  }
  func.func @transform_8(%arg0: i32) -> (i32, i32) {
    %c0_i32 = arith.constant 0 : i32
    %c0_i32_0 = arith.constant 0 : i32
    %c0_i32_1 = arith.constant 0 : i32
    return %c0_i32, %c0_i32_0 : i32, i32
  }
  func.func @transform_9(%arg0: i32) -> (i32, i32) {
    %c0_i32 = arith.constant 0 : i32
    %c0_i32_0 = arith.constant 0 : i32
    return %arg0, %c0_i32 : i32, i32
  }
  func.func @transform_10(%arg0: i32) -> (i32, i32) {
    %c0_i32 = arith.constant 0 : i32
    %c0_i32_0 = arith.constant 0 : i32
    return %arg0, %c0_i32 : i32, i32
  }
  func.func @transform_11(%arg0: i32) -> (i32, i32) {
    %c0_i32 = arith.constant 0 : i32
    %c0_i32_0 = arith.constant 0 : i32
    return %arg0, %c0_i32 : i32, i32
  }
}

</mosaic_0001>

<bundles_post_ra>
// kernel: tpu_custom_call.1
= control target key start
LH: loop header
LB: loop body
LE: loop exit
PB: predicated region body
PF: predicated region fallthrough
CT: control target
= control target key end

     0   :  { %17 = vsyncpa [#allocation3], 0  ;;  %s1271_s0 = inlined_call_operand.hbm [shape: f32[8,256], index: 0, kind: input, shape index: {}]   ;;  %s1272_s1 = inlined_call_operand.hbm [shape: f32[256,128], index: 1, kind: input, shape index: {}]   ;;  %s1273_s2 = inlined_call_operand.vmem [shape: f32[1,128], index: 2, kind: input, shape index: {}]   ;;  %s1274_s3 = inlined_call_operand.hbm [shape: f32[128,256], index: 3, kind: input, shape index: {}]   ;;  %s1275_s4 = inlined_call_operand.vmem [shape: f32[1,256], index: 4, kind: input, shape index: {}]   ;;  %s1276_s5 = inlined_call_operand.hbm [shape: f32[256,256], index: 5, kind: input, shape index: {}]   ;;  %s1277_s6 = inlined_call_operand.vmem [shape: f32[1,256], index: 6, kind: input, shape index: {}]   ;;  %s1278_s7 = inlined_call_operand.hbm [shape: f32[256,128], index: 7, kind: input, shape index: {}]   ;;  %s1279_s8 = inlined_call_operand.vmem [shape: f32[1,128], index: 8, kind: input, shape index: {}]   ;;  %s1280_s9 = inlined_call_operand.hbm [shape: f32[8,128], index: 9, kind: output, shape index: {0}]   ;;  %s1281_s10 = inlined_call_operand.hbm [shape: f32[8,256], index: 10, kind: output, shape index: {1}]   ;;  %s1282_s11 = inlined_call_operand.hbm [shape: f32[8,256], index: 11, kind: output, shape index: {2}]  }
   0x1   :  { %18 = vsyncpa [#allocation6], 0 }
   0x2   :  { %19 = vsyncpa [#allocation9], 0 }
   0x3   :  { %20 = vsyncpa [#allocation4], 0 }
   0x4   :  { %21 = vsyncpa [#allocation13], 0  ;;  %s1070_s17 = smov [#allocation5]   ;;  %s884_s21 = scalar_lea.hbm %s1272_s1, 4096 }
   0x5   :  { %s37_s18 = sshll.u32 %s1070_s17, 4  ;;  %p885_p0 = scmp.ne.s32.totalorder %s1272_s1, %s884_s21  ;;  %s38_s18 = int_to_ptr.vmem [resolvable:$true] %s37_s18 }
   0x6   :  { %p888_p1 = scmp.lt.u32.totalorder %s884_s21, %s1272_s1 }
   0x8   :  { %p890_p2 = pnand %p888_p1, %p885_p0 }
   0xa   :  { %893 = shalt.err (!%p890_p2)
}
   0xb   :  { %s894_s26 = scalar_lea.vmem %s38_s18, 4096  ;;  %p899_p4 = scmp.lt.s32.totalorder %s38_s18, %s38_s18 }
   0xc   :  { %p895_p3 = scmp.ne.s32.totalorder %s38_s18, %s894_s26  ;;  %p900_p5 = scmp.lt.s32.totalorder %s894_s26, %s894_s26 }
   0xe   :  { %p901_p6 = por %p900_p5, %p899_p4 }
  0x10   :  { %p902_p7 = pnand %p901_p6, %p895_p3 }
  0x12   :  { %905 = shalt.err (!%p902_p7)
}
  0x13   :  { %s1071_s27 = smov 128   ;;  %s1072_s28 = smov 8  }
  0x14   :  { %43 = dma.hbm_to_vmem [thread:$0]  %s1272_s1, 4096, %s38_s18, [#allocation6], %s1071_s27, %s1071_s27, %s1072_s28  }
  0x15   :  { %s1073_s12 = smov [#allocation8]   ;;  %s1074_s14 = smov [#allocation2]  }
  0x16   :  { %s65_s13 = sshll.u32 %s1073_s12, 4  ;;  %s28_s15 = sshll.u32 %s1074_s14, 4  ;;  %s66_s13 = int_to_ptr.vmem [resolvable:$true] %s65_s13  ;;  %s29_s15 = int_to_ptr.vmem [resolvable:$true] %s28_s15 }
  0x17   :  { %s906_s19 = scalar_lea.hbm %s1276_s5, 8192 }
  0x18   :  { %p907_p8 = scmp.ne.s32.totalorder %s1276_s5, %s906_s19  ;;  %p910_p9 = scmp.lt.u32.totalorder %s906_s19, %s1276_s5 }
  0x1a   :  { %p912_p10 = pnand %p910_p9, %p907_p8 }
  0x1c   :  { %915 = shalt.err (!%p912_p10)
}
  0x1d   :  { %s916_s1 = scalar_lea.vmem %s66_s13, 8192  ;;  %p921_p12 = scmp.lt.s32.totalorder %s66_s13, %s66_s13 }
  0x1e   :  { %p917_p11 = scmp.ne.s32.totalorder %s66_s13, %s916_s1  ;;  %p922_p13 = scmp.lt.s32.totalorder %s916_s1, %s916_s1 }
  0x20   :  { %p923_p0 = por %p922_p13, %p921_p12 }
  0x22   :  { %p924_p1 = pnand %p923_p0, %p917_p11 }
  0x24   :  { %927 = shalt.err (!%p924_p1)
}
  0x25   :  { %s1075_s18 = smov 256   ;;  %s1076_s24 = smov 16  }
  0x26   :  { %71 = dma.hbm_to_vmem [thread:$0]  %s1276_s5, 8192, %s66_s13, [#allocation9], %s1075_s18, %s1075_s18, %s1076_s24  }
  0x27   :  { %s928_s12 = scalar_lea.hbm %s1271_s0, 256 }
  0x28   :  { %p929_p2 = scmp.ne.s32.totalorder %s1271_s0, %s928_s12  ;;  %p932_p3 = scmp.lt.u32.totalorder %s928_s12, %s1271_s0 }
  0x2a   :  { %p934_p4 = pnand %p932_p3, %p929_p2 }
  0x2c   :  { %937 = shalt.err (!%p934_p4)
}
  0x2d   :  { %s938_s20 = scalar_lea.vmem %s29_s15, 256  ;;  %p943_p6 = scmp.lt.s32.totalorder %s29_s15, %s29_s15 }
  0x2e   :  { %p939_p5 = scmp.ne.s32.totalorder %s29_s15, %s938_s20  ;;  %p944_p7 = scmp.lt.s32.totalorder %s938_s20, %s938_s20 }
  0x30   :  { %p945_p8 = por %p944_p7, %p943_p6 }
  0x32   :  { %p946_p9 = pnand %p945_p8, %p939_p5 }
  0x34   :  { %949 = shalt.err (!%p946_p9)
}
  0x35   :  { %31 = dma.hbm_to_vmem [thread:$0]  %s1271_s0, 256, %s29_s15, [#allocation3]  }
  0x36   :  { %s1077_s21 = smov [#allocation7]   ;;  %s1078_s23 = smov [#allocation10]  }
  0x37   :  { %s51_s22 = sshll.u32 %s1077_s21, 4  ;;  %s79_s1 = sshll.u32 %s1078_s23, 4  ;;  %s52_s22 = int_to_ptr.vmem [resolvable:$true] %s51_s22  ;;  %s80_s1 = int_to_ptr.vmem [resolvable:$true] %s79_s1 }
  0x38   :  { %s950_s29 = scalar_lea.hbm %s1274_s3, 4096 }
  0x39   :  { %p951_p10 = scmp.ne.s32.totalorder %s1274_s3, %s950_s29  ;;  %p954_p11 = scmp.lt.u32.totalorder %s950_s29, %s1274_s3 }
  0x3b   :  { %p956_p12 = pnand %p954_p11, %p951_p10 }
  0x3d   :  { %959 = shalt.err (!%p956_p12)
}
  0x3e   :  { %s960_s0 = scalar_lea.vmem %s52_s22, 4096  ;;  %p965_p0 = scmp.lt.s32.totalorder %s52_s22, %s52_s22 }
  0x3f   :  { %p961_p13 = scmp.ne.s32.totalorder %s52_s22, %s960_s0  ;;  %p966_p1 = scmp.lt.s32.totalorder %s960_s0, %s960_s0 }
  0x41   :  { %p967_p2 = por %p966_p1, %p965_p0 }
  0x43   :  { %p968_p3 = pnand %p967_p2, %p961_p13 }
  0x45   :  { %971 = shalt.err (!%p968_p3)
}
  0x46   :  { %57 = dma.hbm_to_vmem [thread:$0]  %s1274_s3, 4096, %s52_s22, [#allocation6], %s1075_s18, %s1075_s18, %s1076_s24  }
  0x47   :  { %s972_s5 = scalar_lea.hbm %s1278_s7, 4096 }
  0x48   :  { %p973_p4 = scmp.ne.s32.totalorder %s1278_s7, %s972_s5  ;;  %p976_p5 = scmp.lt.u32.totalorder %s972_s5, %s1278_s7 }
  0x4a   :  { %p978_p6 = pnand %p976_p5, %p973_p4 }
  0x4c   :  { %981 = shalt.err (!%p978_p6)
}
  0x4d   :  { %s982_s26 = scalar_lea.vmem %s80_s1, 4096  ;;  %p987_p8 = scmp.lt.s32.totalorder %s80_s1, %s80_s1 }
  0x4e   :  { %p983_p7 = scmp.ne.s32.totalorder %s80_s1, %s982_s26  ;;  %p988_p9 = scmp.lt.s32.totalorder %s982_s26, %s982_s26 }
  0x50   :  { %p989_p10 = por %p988_p9, %p987_p8 }
  0x52   :  { %p990_p11 = pnand %p989_p10, %p983_p7 }
  0x54   :  { %993 = shalt.err (!%p990_p11)
}
  0x55   :  { %85 = dma.hbm_to_vmem [thread:$0]  %s1278_s7, 4096, %s80_s1, [#allocation9], %s1071_s27, %s1071_s27, %s1072_s28  }
  0x56   :  { %1060 = dma.done.wait [#allocation3], 256  }
  0x57   :  { %1061 = vsyncadd [#allocation3], 4294967040 }
  0x58   :  { %1062 = dma.done.wait [#allocation6], 8192  }
  0x59   :  { %1063 = vsyncadd [#allocation6], 4294959104 }
  0x5a   :  { %1064 = dma.done.wait [#allocation9], 12288  }
  0x5b   :  { %1065 = vsyncadd [#allocation9], 4294955008  ;;  %v121_v0 = vld [vmem:[#allocation5 + $0x80] sm:$0xff]  ;;  %v122_v1 = vld [vmem:[#allocation5 + $0x88] sm:$0xff]  ;;  %s1080_s22 = smov [#allocation12]  }
  0x5c   :  { %v105_v2 = vld [vmem:[#allocation5] sm:$0xff]  ;;  %v711_v3 = vpack.c.bf16 %v122_v1, %v121_v0  ;;  %v106_v4 = vld [vmem:[#allocation5 + $0x8] sm:$0xff]  ;;  %v123_v5 = vld [vmem:[#allocation5 + $0x90] sm:$0xff]  ;;  %s611_s1 = sshll.u32 %s1080_s22, 4  ;;  %s612_s1 = int_to_ptr.vmem [resolvable:$true] %s611_s1 }
  0x5d   :  { %v124_v6 = vld [vmem:[#allocation5 + $0x98] sm:$0xff]  ;;  %v713_v7 = vpack.c.bf16 %v106_v4, %v105_v2  ;;  %v107_v9 = vld [vmem:[#allocation5 + $0x10] sm:$0xff]  ;;  %v125_v11 = vld [vmem:[#allocation5 + $0xa0] sm:$0xff]  ;;  %s994_s29 = scalar_lea.vmem %s612_s1, 256  ;;  %p999_p13 = scmp.lt.s32.totalorder %s612_s1, %s612_s1 }
  0x5e   :  { %v715_v8 = vpack.c.bf16 %v124_v6, %v123_v5  ;;  %v108_v10 = vld [vmem:[#allocation5 + $0x18] sm:$0xff]  ;;  %712 = vmatprep.subr.bf16.mxu0 %v711_v3  ;;  %v126_v12 = vld [vmem:[#allocation5 + $0xa8] sm:$0xff]  ;;  %v109_v15 = vld [vmem:[#allocation5 + $0x20] sm:$0xff]  ;;  %p995_p12 = scmp.ne.s32.totalorder %s612_s1, %s994_s29  ;;  %p1000_p0 = scmp.lt.s32.totalorder %s994_s29, %s994_s29 }
  0x5f   :  { %714 = vmatpush3.bf16.msra.mxu0 %v713_v7  ;;  %v717_v13 = vpack.c.bf16 %v108_v10, %v107_v9  ;;  %v719_v14 = vpack.c.bf16 %v126_v12, %v125_v11  ;;  %v110_v16 = vld [vmem:[#allocation5 + $0x28] sm:$0xff]  ;;  %v127_v17 = vld [vmem:[#allocation5 + $0xb0] sm:$0xff]  ;;  %v128_v18 = vld [vmem:[#allocation5 + $0xb8] sm:$0xff] }
  0x60   :  { %716 = vmatprep.subr.bf16.mxu0 %v715_v8  ;;  %v721_v19 = vpack.c.bf16 %v110_v16, %v109_v15  ;;  %v723_v20 = vpack.c.bf16 %v128_v18, %v127_v17  ;;  %v111_v21 = vld [vmem:[#allocation5 + $0x30] sm:$0xff]  ;;  %v112_v22 = vld [vmem:[#allocation5 + $0x38] sm:$0xff]  ;;  %v129_v23 = vld [vmem:[#allocation5 + $0xc0] sm:$0xff]  ;;  %p1001_p1 = por %p1000_p0, %p999_p13 }
  0x61   :  { %v130_v24 = vld [vmem:[#allocation5 + $0xc8] sm:$0xff]  ;;  %v1215_v25 = vld [vmem:[#allocation2 + $0x8] sm:$0xff]  ;;  %v113_v26 = vld [vmem:[#allocation5 + $0x40] sm:$0xff]  ;;  %v725_v30 = vpack.c.bf16 %v112_v22, %v111_v21 }
  0x62   :  { %v114_v27 = vld [vmem:[#allocation5 + $0x48] sm:$0xff]  ;;  %208 = vmatprep.mubr.f32.mxu0 %v1215_v25  ;;  %v218_v29 = vld [vmem:[#allocation7 + $0x18] sm:$0xff]  ;;  %v131_v31 = vld [vmem:[#allocation5 + $0xd0] sm:$0xff]  ;;  %v727_v36 = vpack.c.bf16 %v130_v24, %v129_v23  ;;  %p1002_p2 = pnand %p1001_p1, %p995_p12 }
  0x63   :  { %718 = vmatpush3.bf16.msra.mxu0 %v717_v13  ;;  %v216_v28 = vld [vmem:[#allocation7 + $0x8] sm:$0xff]  ;;  %v215_v33 = vld [vmem:[#allocation7] sm:$0xff]  ;;  %v217_v34 = vld [vmem:[#allocation7 + $0x10] sm:$0xff]  ;;  %v729_v46 = vpack.c.bf16 %v114_v27, %v113_v26 }
  0x64   :  { %720 = vmatprep.subr.bf16.mxu0 %v719_v14  ;;  %v743_v32 = vpack.c.bf16 %v218_v29, %v216_v28  ;;  %v220_v35 = vld [vmem:[#allocation7 + $0x28] sm:$0xff]  ;;  %v745_v37 = vpack.c.bf16 %v217_v34, %v215_v33  ;;  %v222_v38 = vld [vmem:[#allocation7 + $0x38] sm:$0xff]  ;;  %v219_v39 = vld [vmem:[#allocation7 + $0x20] sm:$0xff] }
  0x65   :  { %v221_v40 = vld [vmem:[#allocation7 + $0x30] sm:$0xff]  ;;  %v132_v41 = vld [vmem:[#allocation5 + $0xd8] sm:$0xff]  ;;  %v747_v42 = vpack.c.bf16 %v222_v38, %v220_v35  ;;  %v224_v43 = vld [vmem:[#allocation7 + $0x48] sm:$0xff]  ;;  %v1079_v35 = vmov 0.0  }
  0x66   :  { %744 = vmatprep.subr.bf16.mxu1 %v743_v32  ;;  %v226_v44 = vld [vmem:[#allocation7 + $0x58] sm:$0xff]  ;;  %v749_v45 = vpack.c.bf16 %v221_v40, %v219_v39  ;;  %v115_v47 = vld [vmem:[#allocation5 + $0x50] sm:$0xff]  ;;  %v223_v49 = vld [vmem:[#allocation7 + $0x40] sm:$0xff]  ;;  %v731_v51 = vpack.c.bf16 %v132_v41, %v131_v31  ;;  %323 = vmatprep.mubr.f32.mxu1 %v1079_v35 }
  0x67   :  { %722 = vmatpush3.bf16.msra.mxu0 %v721_v19  ;;  %746 = vmatpush1.bf16.msra.mxu1 %v745_v37  ;;  %v751_v48 = vpack.c.bf16 %v226_v44, %v224_v43  ;;  %v225_v50 = vld [vmem:[#allocation7 + $0x50] sm:$0xff]  ;;  %v116_v52 = vld [vmem:[#allocation5 + $0x58] sm:$0xff]  ;;  %v228_v53 = vld [vmem:[#allocation7 + $0x68] sm:$0xff] }
  0x68   :  { %724 = vmatprep.subr.bf16.mxu0 %v723_v20  ;;  %748 = vmatprep.subr.bf16.mxu1 %v747_v42  ;;  %v230_v54 = vld [vmem:[#allocation7 + $0x78] sm:$0xff]  ;;  %v133_v55 = vld [vmem:[#allocation5 + $0xe0] sm:$0xff]  ;;  %v134_v56 = vld [vmem:[#allocation5 + $0xe8] sm:$0xff]  ;;  %v753_v57 = vpack.c.bf16 %v225_v50, %v223_v49  ;;  %v733_v58 = vpack.c.bf16 %v116_v52, %v115_v47 }
  0x69   :  { %v117_v59 = vld [vmem:[#allocation5 + $0x60] sm:$0xff]  ;;  %v755_v60 = vpack.c.bf16 %v230_v54, %v228_v53  ;;  %v229_v62 = vld [vmem:[#allocation7 + $0x70] sm:$0xff]  ;;  %v735_v63 = vpack.c.bf16 %v134_v56, %v133_v55  ;;  %v118_v0 = vld [vmem:[#allocation5 + $0x68] sm:$0xff] }
  0x6a   :  { %v227_v61 = vld [vmem:[#allocation7 + $0x60] sm:$0xff]  ;;  %v232_v1 = vld [vmem:[#allocation7 + $0x88] sm:$0xff]  ;;  %v234_v2 = vld [vmem:[#allocation7 + $0x98] sm:$0xff]  ;;  %v737_v6 = vpack.c.bf16 %v118_v0, %v117_v59 }
  0x6b   :  { %726 = vmatpush3.bf16.msra.mxu0 %v725_v30  ;;  %750 = vmatpush1.bf16.msra.mxu1 %v749_v45  ;;  %v135_v3 = vld [vmem:[#allocation5 + $0xf0] sm:$0xff]  ;;  %v136_v4 = vld [vmem:[#allocation5 + $0xf8] sm:$0xff]  ;;  %v757_v5 = vpack.c.bf16 %v229_v62, %v227_v61  ;;  %v759_v8 = vpack.c.bf16 %v234_v2, %v232_v1  ;;  %v231_v9 = vld [vmem:[#allocation7 + $0x80] sm:$0xff] }
  0x6c   :  { %728 = vmatprep.subr.bf16.mxu0 %v727_v36  ;;  %752 = vmatprep.subr.bf16.mxu1 %v751_v48  ;;  %v119_v7 = vld [vmem:[#allocation5 + $0x70] sm:$0xff]  ;;  %v739_v11 = vpack.c.bf16 %v136_v4, %v135_v3  ;;  %v120_v12 = vld [vmem:[#allocation5 + $0x78] sm:$0xff]  ;;  %v236_v13 = vld [vmem:[#allocation7 + $0xa8] sm:$0xff] }
  0x6d   :  { %v233_v10 = vld [vmem:[#allocation7 + $0x90] sm:$0xff]  ;;  %v238_v14 = vld [vmem:[#allocation7 + $0xb8] sm:$0xff]  ;;  %v741_v16 = vpack.c.bf16 %v120_v12, %v119_v7  ;;  %v235_v18 = vld [vmem:[#allocation7 + $0xa0] sm:$0xff] }
  0x6e   :  { %v761_v15 = vpack.c.bf16 %v233_v10, %v231_v9  ;;  %v763_v17 = vpack.c.bf16 %v238_v14, %v236_v13  ;;  %v237_v19 = vld [vmem:[#allocation7 + $0xb0] sm:$0xff]  ;;  %v240_v22 = vld [vmem:[#allocation7 + $0xc8] sm:$0xff]  ;;  %v242_v23 = vld [vmem:[#allocation7 + $0xd8] sm:$0xff] }
  0x6f   :  { %730 = vmatpush3.bf16.msra.mxu0 %v729_v46  ;;  %754 = vmatpush1.bf16.msra.mxu1 %v753_v57  ;;  %v765_v20 = vpack.c.bf16 %v237_v19, %v235_v18  ;;  %v1218_v21 = vld [vmem:[#allocation2] sm:$0xff]  ;;  %v767_v24 = vpack.c.bf16 %v242_v23, %v240_v22  ;;  %v239_v26 = vld [vmem:[#allocation7 + $0xc0] sm:$0xff]  ;;  %v244_v29 = vld [vmem:[#allocation7 + $0xe8] sm:$0xff] }
  0x70   :  { %732 = vmatprep.subr.bf16.mxu0 %v731_v51  ;;  %756 = vmatprep.subr.bf16.mxu1 %v755_v60  ;;  %v241_v27 = vld [vmem:[#allocation7 + $0xd0] sm:$0xff]  ;;  %v246_v30 = vld [vmem:[#allocation7 + $0xf8] sm:$0xff]  ;;  %v243_v32 = vld [vmem:[#allocation7 + $0xe0] sm:$0xff] }
  0x71   :  { %v769_v28 = vpack.c.bf16 %v241_v27, %v239_v26  ;;  %v771_v31 = vpack.c.bf16 %v246_v30, %v244_v29  ;;  %v245_v33 = vld [vmem:[#allocation7 + $0xf0] sm:$0xff]  ;;  %v333_v36 = vld [vmem:[#allocation8 + $0x8] sm:$0xff]  ;;  %v335_v37 = vld [vmem:[#allocation8 + $0x18] sm:$0xff] }
  0x72   :  { %v773_v34 = vpack.c.bf16 %v245_v33, %v243_v32  ;;  %v332_v38 = vld [vmem:[#allocation8] sm:$0xff]  ;;  %v775_v39 = vpack.c.bf16 %v335_v37, %v333_v36  ;;  %v334_v40 = vld [vmem:[#allocation8 + $0x10] sm:$0xff]  ;;  %v337_v41 = vld [vmem:[#allocation8 + $0x28] sm:$0xff] }
  0x73   :  { %734 = vmatpush3.bf16.msra.mxu0 %v733_v58  ;;  %758 = vmatpush1.bf16.msra.mxu1 %v757_v5  ;;  %v339_v42 = vld [vmem:[#allocation8 + $0x38] sm:$0xff]  ;;  %v777_v43 = vpack.c.bf16 %v334_v40, %v332_v38  ;;  %v336_v45 = vld [vmem:[#allocation8 + $0x20] sm:$0xff]  ;;  %v338_v46 = vld [vmem:[#allocation8 + $0x30] sm:$0xff] }
  0x74   :  { %736 = vmatprep.subr.bf16.mxu0 %v735_v63  ;;  %760 = vmatprep.subr.bf16.mxu1 %v759_v8  ;;  %v779_v44 = vpack.c.bf16 %v339_v42, %v337_v41  ;;  %v341_v47 = vld [vmem:[#allocation8 + $0x48] sm:$0xff]  ;;  %v343_v48 = vld [vmem:[#allocation8 + $0x58] sm:$0xff]  ;;  %v781_v49 = vpack.c.bf16 %v338_v46, %v336_v45  ;;  %v340_v51 = vld [vmem:[#allocation8 + $0x40] sm:$0xff] }
  0x75   :  { %v783_v50 = vpack.c.bf16 %v343_v48, %v341_v47  ;;  %v342_v52 = vld [vmem:[#allocation8 + $0x50] sm:$0xff]  ;;  %v345_v53 = vld [vmem:[#allocation8 + $0x68] sm:$0xff]  ;;  %v347_v54 = vld [vmem:[#allocation8 + $0x78] sm:$0xff] }
  0x76   :  { %v785_v55 = vpack.c.bf16 %v342_v52, %v340_v51  ;;  %v787_v56 = vpack.c.bf16 %v347_v54, %v345_v53  ;;  %v344_v57 = vld [vmem:[#allocation8 + $0x60] sm:$0xff]  ;;  %v346_v58 = vld [vmem:[#allocation8 + $0x70] sm:$0xff]  ;;  %v349_v59 = vld [vmem:[#allocation8 + $0x88] sm:$0xff] }
  0x77   :  { %738 = vmatpush3.bf16.msra.mxu0 %v737_v6  ;;  %762 = vmatpush1.bf16.msra.mxu1 %v761_v15  ;;  %v351_v60 = vld [vmem:[#allocation8 + $0x98] sm:$0xff]  ;;  %v789_v61 = vpack.c.bf16 %v346_v58, %v344_v57  ;;  %v348_v63 = vld [vmem:[#allocation8 + $0x80] sm:$0xff]  ;;  %v350_v0 = vld [vmem:[#allocation8 + $0x90] sm:$0xff] }
  0x78   :  { %740 = vmatprep.subr.bf16.mxu0 %v739_v11  ;;  %764 = vmatprep.subr.bf16.mxu1 %v763_v17  ;;  %v791_v62 = vpack.c.bf16 %v351_v60, %v349_v59  ;;  %v353_v1 = vld [vmem:[#allocation8 + $0xa8] sm:$0xff]  ;;  %v355_v2 = vld [vmem:[#allocation8 + $0xb8] sm:$0xff]  ;;  %v793_v3 = vpack.c.bf16 %v350_v0, %v348_v63  ;;  %v352_v5 = vld [vmem:[#allocation8 + $0xa0] sm:$0xff] }
  0x79   :  { %v795_v4 = vpack.c.bf16 %v355_v2, %v353_v1  ;;  %v354_v6 = vld [vmem:[#allocation8 + $0xb0] sm:$0xff]  ;;  %v357_v7 = vld [vmem:[#allocation8 + $0xc8] sm:$0xff]  ;;  %v359_v8 = vld [vmem:[#allocation8 + $0xd8] sm:$0xff] }
  0x7a   :  { %v797_v9 = vpack.c.bf16 %v354_v6, %v352_v5  ;;  %v799_v10 = vpack.c.bf16 %v359_v8, %v357_v7  ;;  %v356_v11 = vld [vmem:[#allocation8 + $0xc0] sm:$0xff]  ;;  %v358_v12 = vld [vmem:[#allocation8 + $0xd0] sm:$0xff]  ;;  %v361_v13 = vld [vmem:[#allocation8 + $0xe8] sm:$0xff] }
  0x7b   :  { %742 = vmatpush3.bf16.msra.mxu0 %v741_v16  ;;  %766 = vmatpush1.bf16.msra.mxu1 %v765_v20  ;;  %v363_v14 = vld [vmem:[#allocation8 + $0xf8] sm:$0xff]  ;;  %v801_v15 = vpack.c.bf16 %v358_v12, %v356_v11  ;;  %v360_v17 = vld [vmem:[#allocation8 + $0xe0] sm:$0xff]  ;;  %v362_v18 = vld [vmem:[#allocation8 + $0xf0] sm:$0xff] }
  0x7c   :  { %768 = vmatprep.subr.bf16.mxu1 %v767_v24  ;;  %776 = vmatprep.subr.bf16.mxu0 %v775_v39  ;;  %v803_v16 = vpack.c.bf16 %v363_v14, %v361_v13  ;;  %v365_v19 = vld [vmem:[#allocation8 + $0x108] sm:$0xff]  ;;  %v367_v20 = vld [vmem:[#allocation8 + $0x118] sm:$0xff]  ;;  %v805_v22 = vpack.c.bf16 %v362_v18, %v360_v17  ;;  %v364_v24 = vld [vmem:[#allocation8 + $0x100] sm:$0xff] }
  0x7d   :  { %v807_v23 = vpack.c.bf16 %v367_v20, %v365_v19  ;;  %v366_v26 = vld [vmem:[#allocation8 + $0x110] sm:$0xff]  ;;  %v369_v27 = vld [vmem:[#allocation8 + $0x128] sm:$0xff]  ;;  %v372_v37 = vld [vmem:[#allocation8 + $0x140] sm:$0xff] }
  0x7e   :  { %209 = vmatmul.mubr.f32.vlgmr.msra.gmra.mrb[0].mxu0 %v1218_v21  ;;  %v809_v29 = vpack.c.bf16 %v366_v26, %v364_v24  ;;  %v370_v32 = vld [vmem:[#allocation8 + $0x130] sm:$0xff]  ;;  %v373_v33 = vld [vmem:[#allocation8 + $0x148] sm:$0xff]  ;;  %v379_v40 = vld [vmem:[#allocation8 + $0x178] sm:$0xff] }
  0x7f   :  { %770 = vmatpush1.bf16.msra.mxu1 %v769_v28  ;;  %778 = vmatpush1.bf16.msra.mxu0 %v777_v43  ;;  %v371_v28 = vld [vmem:[#allocation8 + $0x138] sm:$0xff]  ;;  %v374_v38 = vld [vmem:[#allocation8 + $0x150] sm:$0xff]  ;;  %v377_v39 = vld [vmem:[#allocation8 + $0x168] sm:$0xff] }
  0x80   :  { %772 = vmatprep.subr.bf16.mxu1 %v771_v31  ;;  %780 = vmatprep.subr.bf16.mxu0 %v779_v44  ;;  %v811_v30 = vpack.c.bf16 %v371_v28, %v369_v27  ;;  %v368_v31 = vld [vmem:[#allocation8 + $0x120] sm:$0xff]  ;;  %v817_v41 = vpack.c.bf16 %v374_v38, %v372_v37  ;;  %v819_v42 = vpack.c.bf16 %v379_v40, %v377_v39  ;;  %v378_v44 = vld [vmem:[#allocation8 + $0x170] sm:$0xff]  ;;  %v381_v45 = vld [vmem:[#allocation8 + $0x188] sm:$0xff] }
  0x81   :  { %v813_v35 = vpack.c.bf16 %v370_v32, %v368_v31  ;;  %v376_v43 = vld [vmem:[#allocation8 + $0x160] sm:$0xff]  ;;  %v383_v46 = vld [vmem:[#allocation8 + $0x198] sm:$0xff]  ;;  %v385_v51 = vld [vmem:[#allocation8 + $0x1a8] sm:$0xff] }
  0x82   :  { %v821_v47 = vpack.c.bf16 %v378_v44, %v376_v43  ;;  %v823_v48 = vpack.c.bf16 %v383_v46, %v381_v45  ;;  %v387_v52 = vld [vmem:[#allocation8 + $0x1b8] sm:$0xff]  ;;  %v389_v57 = vld [vmem:[#allocation8 + $0x1c8] sm:$0xff]  ;;  %v497_v12 = vld [vmem:[#allocation10 + $0x80] sm:$0xff] }
  0x83   :  { %774 = vmatpush1.bf16.msra.mxu1 %v773_v34  ;;  %782 = vmatpush1.bf16.msra.mxu0 %v781_v49  ;;  %v375_v34 = vld [vmem:[#allocation8 + $0x158] sm:$0xff]  ;;  %v380_v49 = vld [vmem:[#allocation8 + $0x180] sm:$0xff]  ;;  %v827_v54 = vpack.c.bf16 %v387_v52, %v385_v51  ;;  %v393_v6 = vld [vmem:[#allocation8 + $0x1e8] sm:$0xff] }
  0x84   :  { %784 = vmatprep.subr.bf16.mxu0 %v783_v50  ;;  %v815_v36 = vpack.c.bf16 %v375_v34, %v373_v33  ;;  %v382_v50 = vld [vmem:[#allocation8 + $0x190] sm:$0xff]  ;;  %v391_v58 = vld [vmem:[#allocation8 + $0x1d8] sm:$0xff]  ;;  %v498_v13 = vld [vmem:[#allocation10 + $0x88] sm:$0xff] }
  0x85   :  { %v825_v53 = vpack.c.bf16 %v382_v50, %v380_v49  ;;  %v831_v60 = vpack.c.bf16 %v391_v58, %v389_v57  ;;  %v395_v7 = vld [vmem:[#allocation8 + $0x1f8] sm:$0xff]  ;;  %v481_v14 = vld [vmem:[#allocation10] sm:$0xff]  ;;  %v499_v17 = vld [vmem:[#allocation10 + $0x90] sm:$0xff] }
  0x86   :  { %v835_v8 = vpack.c.bf16 %v395_v7, %v393_v6  ;;  %v500_v18 = vld [vmem:[#allocation10 + $0x98] sm:$0xff]  ;;  %v501_v24 = vld [vmem:[#allocation10 + $0xa0] sm:$0xff]  ;;  %v502_v26 = vld [vmem:[#allocation10 + $0xa8] sm:$0xff] }
  0x87   :  { %786 = vmatpush1.bf16.msra.mxu0 %v785_v55  ;;  %v384_v55 = vld [vmem:[#allocation8 + $0x1a0] sm:$0xff]  ;;  %v843_v20 = vpack.c.bf16 %v500_v18, %v499_v17  ;;  %v847_v28 = vpack.c.bf16 %v502_v26, %v501_v24  ;;  %v503_v31 = vld [vmem:[#allocation10 + $0xb0] sm:$0xff]  ;;  %v504_v32 = vld [vmem:[#allocation10 + $0xb8] sm:$0xff] }
  0x88   :  { %788 = vmatprep.subr.bf16.mxu0 %v787_v56  ;;  %v386_v56 = vld [vmem:[#allocation8 + $0x1b0] sm:$0xff]  ;;  %v851_v34 = vpack.c.bf16 %v504_v32, %v503_v31  ;;  %v505_v37 = vld [vmem:[#allocation10 + $0xc0] sm:$0xff]  ;;  %v506_v38 = vld [vmem:[#allocation10 + $0xc8] sm:$0xff] }
  0x89   :  { %v829_v59 = vpack.c.bf16 %v386_v56, %v384_v55  ;;  %v855_v40 = vpack.c.bf16 %v506_v38, %v505_v37  ;;  %v507_v43 = vld [vmem:[#allocation10 + $0xd0] sm:$0xff]  ;;  %v508_v44 = vld [vmem:[#allocation10 + $0xd8] sm:$0xff]  ;;  %v509_v49 = vld [vmem:[#allocation10 + $0xe0] sm:$0xff] }
  0x8a   :  { %v859_v46 = vpack.c.bf16 %v508_v44, %v507_v43  ;;  %v510_v50 = vld [vmem:[#allocation10 + $0xe8] sm:$0xff]  ;;  %v247_v56 = vld [vmem:[%s1275_s4] sm:$0x3]  ;;  %v512_v6 = vld [vmem:[#allocation10 + $0xf8] sm:$0xff] }
  0x8b   :  { %790 = vmatpush1.bf16.msra.mxu0 %v789_v61  ;;  %v863_v52 = vpack.c.bf16 %v510_v50, %v509_v49 }
  0x8c   :  { %792 = vmatprep.subr.bf16.mxu0 %v791_v62  ;;  %v639_v62 = vld [vmem:[%s1273_s2] ss:$0 sm:$0xff] }
  0x8f   :  { %794 = vmatpush1.bf16.msra.mxu0 %v793_v3  ;;  %v388_v3 = vld [vmem:[#allocation8 + $0x1c0] sm:$0xff] }
  0x90   :  { %796 = vmatprep.subr.bf16.mxu0 %v795_v4  ;;  %v390_v4 = vld [vmem:[#allocation8 + $0x1d0] sm:$0xff] }
  0x91   :  { %v833_v5 = vpack.c.bf16 %v390_v4, %v388_v3  ;;  %v494_v3 = vld [vmem:[#allocation10 + $0x68] sm:$0xff] }
  0x93   :  { %798 = vmatpush1.bf16.msra.mxu0 %v797_v9  ;;  %v392_v9 = vld [vmem:[#allocation8 + $0x1e0] sm:$0xff] }
  0x94   :  { %800 = vmatprep.subr.bf16.mxu0 %v799_v10  ;;  %v394_v10 = vld [vmem:[#allocation8 + $0x1f0] sm:$0xff] }
  0x95   :  { %v837_v11 = vpack.c.bf16 %v394_v10, %v392_v9  ;;  %v496_v9 = vld [vmem:[#allocation10 + $0x78] sm:$0xff] }
  0x97   :  { %802 = vmatpush1.bf16.msra.mxu0 %v801_v15  ;;  %v839_v15 = vpack.c.bf16 %v498_v13, %v497_v12 }
  0x98   :  { %804 = vmatprep.subr.bf16.mxu0 %v803_v16  ;;  %v482_v16 = vld [vmem:[#allocation10 + $0x8] sm:$0xff] }
  0x99   :  { %v841_v19 = vpack.c.bf16 %v482_v16, %v481_v14  ;;  %840 = vmatprep.subr.bf16.mxu1 %v839_v15 }
  0x9b   :  { %806 = vmatpush1.bf16.msra.mxu0 %v805_v22  ;;  %v483_v22 = vld [vmem:[#allocation10 + $0x10] sm:$0xff] }
  0x9c   :  { %808 = vmatprep.subr.bf16.mxu0 %v807_v23  ;;  %v484_v23 = vld [vmem:[#allocation10 + $0x18] sm:$0xff] }
  0x9d   :  { %v845_v27 = vpack.c.bf16 %v484_v23, %v483_v22 }
  0x9f   :  { %810 = vmatpush1.bf16.msra.mxu0 %v809_v29  ;;  %v485_v29 = vld [vmem:[#allocation10 + $0x20] sm:$0xff] }
  0xa0   :  { %812 = vmatprep.subr.bf16.mxu0 %v811_v30  ;;  %v486_v30 = vld [vmem:[#allocation10 + $0x28] sm:$0xff] }
  0xa1   :  { %v849_v33 = vpack.c.bf16 %v486_v30, %v485_v29 }
  0xa3   :  { %814 = vmatpush1.bf16.msra.mxu0 %v813_v35  ;;  %v487_v35 = vld [vmem:[#allocation10 + $0x30] sm:$0xff] }
  0xa4   :  { %816 = vmatprep.subr.bf16.mxu0 %v815_v36  ;;  %v488_v36 = vld [vmem:[#allocation10 + $0x38] sm:$0xff] }
  0xa5   :  { %v853_v39 = vpack.c.bf16 %v488_v36, %v487_v35 }
  0xa7   :  { %818 = vmatpush1.bf16.msra.mxu0 %v817_v41  ;;  %v489_v41 = vld [vmem:[#allocation10 + $0x40] sm:$0xff] }
  0xa8   :  { %820 = vmatprep.subr.bf16.mxu0 %v819_v42  ;;  %v490_v42 = vld [vmem:[#allocation10 + $0x48] sm:$0xff] }
  0xa9   :  { %v857_v45 = vpack.c.bf16 %v490_v42, %v489_v41 }
  0xab   :  { %822 = vmatpush1.bf16.msra.mxu0 %v821_v47  ;;  %v491_v47 = vld [vmem:[#allocation10 + $0x50] sm:$0xff] }
  0xac   :  { %824 = vmatprep.subr.bf16.mxu0 %v823_v48  ;;  %v492_v48 = vld [vmem:[#allocation10 + $0x58] sm:$0xff] }
  0xad   :  { %v861_v51 = vpack.c.bf16 %v492_v48, %v491_v47 }
  0xaf   :  { %826 = vmatpush1.bf16.msra.mxu0 %v825_v53  ;;  %v249_v53 = vlaneseq }
  0xb0   :  { %828 = vmatprep.subr.bf16.mxu0 %v827_v54 }
  0xb1   :  { %v250_v54 = vshrl.u32 %v249_v53, 7 }
  0xb3   :  { %830 = vmatpush1.bf16.msra.mxu0 %v829_v59  ;;  %v251_v55 = vsub.s32 0, %v250_v54  ;;  %v255_v57 = vsub.s32 1, %v250_v54 }
  0xb4   :  { %832 = vmatprep.subr.bf16.mxu0 %v831_v60 }
  0xb5   :  { %v252_v58 = vrot.slane %v247_v56, %v251_v55  ;;  %v256_v59 = vrot.slane %v247_v56, %v255_v57 }
  0xb7   :  { %834 = vmatpush1.bf16.msra.mxu0 %v833_v5  ;;  %v511_v5 = vld [vmem:[#allocation10 + $0xf0] sm:$0xff] }
  0xb8   :  { %836 = vmatprep.subr.bf16.mxu0 %v835_v8  ;;  %v867_v7 = vpack.c.bf16 %v512_v6, %v511_v5  ;;  %v495_v8 = vld [vmem:[#allocation10 + $0x70] sm:$0xff] }
  0xb9   :  { %v869_v10 = vpack.c.bf16 %v496_v9, %v495_v8 }
  0xbb   :  { %838 = vmatpush1.bf16.msra.mxu0 %v837_v11 }
 0x151   :  { %v673_v61 = vpop.f32.mrb[0].mxu0 }
 0x152   :  { %v674_v63 = vpop.f32.mrb[1].mxu0 }
 0x153   :  { %v675_v0 = vadd.f32 %v674_v63, %v673_v61 }
 0x155   :  { %v211_v1 = vadd.f32 %v675_v0, %v639_v62 }
 0x157   :  { %v214_v2 = vmax.f32 %v211_v1, 0.0 }
 0x159   :  { %324 = vmatmul.mubr.f32.vlgmr.msra.gmra.mrb[0].mxu1 %v214_v2  ;;  %v493_v2 = vld [vmem:[#allocation10 + $0x60] sm:$0xff] }
 0x15a   :  { %842 = vmatpush3.bf16.msra.mxu1 %v841_v19  ;;  %v865_v4 = vpack.c.bf16 %v494_v3, %v493_v2 }
 0x15b   :  { %844 = vmatprep.subr.bf16.mxu1 %v843_v20 }
 0x15e   :  { %846 = vmatpush3.bf16.msra.mxu1 %v845_v27 }
 0x15f   :  { %848 = vmatprep.subr.bf16.mxu1 %v847_v28 }
 0x162   :  { %850 = vmatpush3.bf16.msra.mxu1 %v849_v33 }
 0x163   :  { %852 = vmatprep.subr.bf16.mxu1 %v851_v34 }
 0x166   :  { %854 = vmatpush3.bf16.msra.mxu1 %v853_v39 }
 0x167   :  { %856 = vmatprep.subr.bf16.mxu1 %v855_v40 }
 0x16a   :  { %858 = vmatpush3.bf16.msra.mxu1 %v857_v45 }
 0x16b   :  { %860 = vmatprep.subr.bf16.mxu1 %v859_v46 }
 0x16e   :  { %862 = vmatpush3.bf16.msra.mxu1 %v861_v51 }
 0x16f   :  { %864 = vmatprep.subr.bf16.mxu1 %v863_v52 }
 0x172   :  { %866 = vmatpush3.bf16.msra.mxu1 %v865_v4 }
 0x173   :  { %868 = vmatprep.subr.bf16.mxu1 %v867_v7 }
 0x176   :  { %870 = vmatpush3.bf16.msra.mxu1 %v869_v10 }
 0x22c   :  { %v325_v60 = vpop.f32.mrb[0].mxu1 }
 0x22d   :  { %v326_v61 = vadd.f32 %v325_v60, %v252_v58  ;;  %v327_v62 = vpop.f32.mrb[1].mxu1 }
 0x22e   :  { %v328_v63 = vadd.f32 %v327_v62, %v256_v59 }
 0x22f   :  { %v330_v0 = vadd.f32 %v326_v61, %v1218_v21  ;;  %593 = vst [vmem:[#allocation14] sm:$0xff] %v326_v61 }
 0x230   :  { %v331_v1 = vadd.f32 %v328_v63, %v1215_v25  ;;  %594 = vst [vmem:[#allocation14 + $0x8] sm:$0xff] %v328_v63  ;;  %v396_v25 = vld [vmem:[%s1277_s6] sm:$0x3] }
 0x231   :  { %591 = vst [vmem:[#allocation12] sm:$0xff] %v330_v0  ;;  %v401_v21 = vrot.slane %v396_v25, %v251_v55  ;;  %v405_v11 = vrot.slane %v396_v25, %v255_v57 }
 0x232   :  { %592 = vst [vmem:[#allocation12 + $0x8] sm:$0xff] %v331_v1  ;;  %472 = vmatprep.mubr.f32.mxu0 %v331_v1 }
 0x233   :  { %473 = vmatmul.mubr.f32.vlgmr.msra.gmra.mrb[2].mxu0 %v330_v0 }
 0x306   :  { %v474_v12 = vpop.f32.mrb[2].mxu0 }
 0x307   :  { %v475_v13 = vadd.f32 %v474_v12, %v401_v21  ;;  %v476_v14 = vpop.f32.mrb[3].mxu0 }
 0x308   :  { %v477_v15 = vadd.f32 %v476_v14, %v405_v11 }
 0x309   :  { %v479_v17 = vmax.f32 %v475_v13, 0.0 }
 0x30a   :  { %v480_v16 = vmax.f32 %v477_v15, 0.0 }
 0x30c   :  { %584 = vmatprep.mubr.f32.mxu1 %v480_v16 }
 0x30d   :  { %585 = vmatmul.mubr.f32.vlgmr.msra.gmra.mrb[2].mxu1 %v479_v17 }
 0x30e   :  { %1005 = shalt.err (!%p1002_p2)
}
 0x30f   :  { %s1006_s12 = scalar_lea.hbm %s1281_s10, 256 }
 0x310   :  { %p1007_p3 = scmp.ne.s32.totalorder %s1281_s10, %s1006_s12  ;;  %p1010_p4 = scmp.lt.u32.totalorder %s1006_s12, %s1281_s10 }
 0x312   :  { %p1012_p5 = pnand %p1010_p4, %p1007_p3 }
 0x314   :  { %1015 = shalt.err (!%p1012_p5)
}
 0x315   :  { %614 = dma.vmem_to_hbm [thread:$0]  %s612_s1, 256, %s1281_s10, [#allocation13]  }
 0x316   :  { %s1081_s20 = smov [#allocation14]  }
 0x317   :  { %s621_s5 = sshll.u32 %s1081_s20, 4  ;;  %s622_s5 = int_to_ptr.vmem [resolvable:$true] %s621_s5 }
 0x318   :  { %s1016_s13 = scalar_lea.vmem %s622_s5, 256  ;;  %p1021_p7 = scmp.lt.s32.totalorder %s622_s5, %s622_s5 }
 0x319   :  { %p1017_p6 = scmp.ne.s32.totalorder %s622_s5, %s1016_s13  ;;  %p1022_p8 = scmp.lt.s32.totalorder %s1016_s13, %s1016_s13 }
 0x31b   :  { %p1023_p9 = por %p1022_p8, %p1021_p7 }
 0x31d   :  { %p1024_p10 = pnand %p1023_p9, %p1017_p6 }
 0x31f   :  { %1027 = shalt.err (!%p1024_p10)
}
 0x320   :  { %s1028_s25 = scalar_lea.hbm %s1282_s11, 256 }
 0x321   :  { %p1029_p11 = scmp.ne.s32.totalorder %s1282_s11, %s1028_s25  ;;  %p1032_p12 = scmp.lt.u32.totalorder %s1028_s25, %s1282_s11 }
 0x323   :  { %p1034_p13 = pnand %p1032_p12, %p1029_p11 }
 0x325   :  { %1037 = shalt.err (!%p1034_p13)
}
 0x326   :  { %624 = dma.vmem_to_hbm [thread:$0]  %s622_s5, 256, %s1282_s11, [#allocation13]   ;;  %v640_v19 = vld [vmem:[%s1279_s8] ss:$0 sm:$0xff] }
 0x327   :  { %s1082_s4 = smov [#allocation11]  }
 0x328   :  { %s601_s24 = sshll.u32 %s1082_s4, 4  ;;  %s602_s24 = int_to_ptr.vmem [resolvable:$true] %s601_s24 }
 0x329   :  { %s1038_s22 = scalar_lea.vmem %s602_s24, 128  ;;  %p1043_p1 = scmp.lt.s32.totalorder %s602_s24, %s602_s24 }
 0x32a   :  { %p1039_p0 = scmp.ne.s32.totalorder %s602_s24, %s1038_s22  ;;  %p1044_p2 = scmp.lt.s32.totalorder %s1038_s22, %s1038_s22 }
 0x32c   :  { %p1045_p3 = por %p1044_p2, %p1043_p1 }
 0x32e   :  { %p1046_p4 = pnand %p1045_p3, %p1039_p0 }
 0x3e0   :  { %v708_v18 = vpop.f32.mrb[2].mxu1 }
 0x3e1   :  { %v709_v20 = vpop.f32.mrb[3].mxu1 }
 0x3e2   :  { %v710_v22 = vadd.f32 %v709_v20, %v708_v18 }
 0x3e4   :  { %v587_v23 = vadd.f32 %v710_v22, %v640_v19 }
 0x3e6   :  { %590 = vst [vmem:[#allocation11] sm:$0xff] %v587_v23 }
 0x3e7   :  { %1049 = shalt.err (!%p1046_p4)
}
 0x3e8   :  { %s1050_s29 = scalar_lea.hbm %s1280_s9, 128 }
 0x3e9   :  { %p1051_p5 = scmp.ne.s32.totalorder %s1280_s9, %s1050_s29  ;;  %p1054_p6 = scmp.lt.u32.totalorder %s1050_s29, %s1280_s9 }
 0x3eb   :  { %p1056_p7 = pnand %p1054_p6, %p1051_p5 }
 0x3ed   :  { %1059 = shalt.err (!%p1056_p7)
}
 0x3ee   :  { %604 = dma.vmem_to_hbm [thread:$0]  %s602_s24, 128, %s1280_s9, [#allocation4]  }
 0x3ef   :  { %1066 = dma.done.wait [#allocation4], 128  }
 0x3f0   :  { %1067 = vsyncadd [#allocation4], 4294967168 }
 0x3f1   :  { %1068 = dma.done.wait [#allocation13], 512  }
 0x3f2   :  { %1069 = vsyncadd [#allocation13], 4294966784 }
 0x3f3   :  { %634 = vsyncpa [#allocation3], 1 }
 0x3f4   :  { %635 = vsyncpa [#allocation6], 1 }
 0x3f5   :  { %636 = vsyncpa [#allocation9], 1 }
 0x3f6   :  { %637 = vsyncpa [#allocation4], 1 }
 0x3f7   :  { %638 = vsyncpa [#allocation13], 1 }

// kernel: tpu_custom_call.1
= control target key start
LH: loop header
LB: loop body
LE: loop exit
PB: predicated region body
PF: predicated region fallthrough
CT: control target
= control target key end

     0   :  { %17 = vsyncpa [#allocation3], 0  ;;  %s1271_s0 = inlined_call_operand.hbm [shape: f32[8,256], index: 0, kind: input, shape index: {}]   ;;  %s1272_s1 = inlined_call_operand.hbm [shape: f32[256,128], index: 1, kind: input, shape index: {}]   ;;  %s1273_s2 = inlined_call_operand.vmem [shape: f32[1,128], index: 2, kind: input, shape index: {}]   ;;  %s1274_s3 = inlined_call_operand.hbm [shape: f32[128,256], index: 3, kind: input, shape index: {}]   ;;  %s1275_s4 = inlined_call_operand.vmem [shape: f32[1,256], index: 4, kind: input, shape index: {}]   ;;  %s1276_s5 = inlined_call_operand.hbm [shape: f32[256,256], index: 5, kind: input, shape index: {}]   ;;  %s1277_s6 = inlined_call_operand.vmem [shape: f32[1,256], index: 6, kind: input, shape index: {}]   ;;  %s1278_s7 = inlined_call_operand.hbm [shape: f32[256,128], index: 7, kind: input, shape index: {}]   ;;  %s1279_s8 = inlined_call_operand.vmem [shape: f32[1,128], index: 8, kind: input, shape index: {}]   ;;  %s1280_s9 = inlined_call_operand.hbm [shape: f32[8,128], index: 9, kind: output, shape index: {0}]   ;;  %s1281_s10 = inlined_call_operand.hbm [shape: f32[8,256], index: 10, kind: output, shape index: {1}]   ;;  %s1282_s11 = inlined_call_operand.hbm [shape: f32[8,256], index: 11, kind: output, shape index: {2}]  }
   0x1   :  { %18 = vsyncpa [#allocation6], 0 }
   0x2   :  { %19 = vsyncpa [#allocation9], 0 }
   0x3   :  { %20 = vsyncpa [#allocation4], 0 }
   0x4   :  { %21 = vsyncpa [#allocation13], 0  ;;  %s1070_s17 = smov [#allocation5]   ;;  %s884_s21 = scalar_lea.hbm %s1272_s1, 4096 }
   0x5   :  { %s37_s18 = sshll.u32 %s1070_s17, 4  ;;  %p885_p0 = scmp.ne.s32.totalorder %s1272_s1, %s884_s21  ;;  %s38_s18 = int_to_ptr.vmem [resolvable:$true] %s37_s18 }
   0x6   :  { %p888_p1 = scmp.lt.u32.totalorder %s884_s21, %s1272_s1 }
   0x8   :  { %p890_p2 = pnand %p888_p1, %p885_p0 }
   0xa   :  { %893 = shalt.err (!%p890_p2)
}
   0xb   :  { %s894_s26 = scalar_lea.vmem %s38_s18, 4096  ;;  %p899_p4 = scmp.lt.s32.totalorder %s38_s18, %s38_s18 }
   0xc   :  { %p895_p3 = scmp.ne.s32.totalorder %s38_s18, %s894_s26  ;;  %p900_p5 = scmp.lt.s32.totalorder %s894_s26, %s894_s26 }
   0xe   :  { %p901_p6 = por %p900_p5, %p899_p4 }
  0x10   :  { %p902_p7 = pnand %p901_p6, %p895_p3 }
  0x12   :  { %905 = shalt.err (!%p902_p7)
}
  0x13   :  { %s1071_s27 = smov 128   ;;  %s1072_s28 = smov 8  }
  0x14   :  { %43 = dma.hbm_to_vmem [thread:$0]  %s1272_s1, 4096, %s38_s18, [#allocation6], %s1071_s27, %s1071_s27, %s1072_s28  }
  0x15   :  { %s1073_s12 = smov [#allocation8]   ;;  %s1074_s14 = smov [#allocation2]  }
  0x16   :  { %s65_s13 = sshll.u32 %s1073_s12, 4  ;;  %s28_s15 = sshll.u32 %s1074_s14, 4  ;;  %s66_s13 = int_to_ptr.vmem [resolvable:$true] %s65_s13  ;;  %s29_s15 = int_to_ptr.vmem [resolvable:$true] %s28_s15 }
  0x17   :  { %s906_s19 = scalar_lea.hbm %s1276_s5, 8192 }
  0x18   :  { %p907_p8 = scmp.ne.s32.totalorder %s1276_s5, %s906_s19  ;;  %p910_p9 = scmp.lt.u32.totalorder %s906_s19, %s1276_s5 }
  0x1a   :  { %p912_p10 = pnand %p910_p9, %p907_p8 }
  0x1c   :  { %915 = shalt.err (!%p912_p10)
}
  0x1d   :  { %s916_s1 = scalar_lea.vmem %s66_s13, 8192  ;;  %p921_p12 = scmp.lt.s32.totalorder %s66_s13, %s66_s13 }
  0x1e   :  { %p917_p11 = scmp.ne.s32.totalorder %s66_s13, %s916_s1  ;;  %p922_p13 = scmp.lt.s32.totalorder %s916_s1, %s916_s1 }
  0x20   :  { %p923_p0 = por %p922_p13, %p921_p12 }
  0x22   :  { %p924_p1 = pnand %p923_p0, %p917_p11 }
  0x24   :  { %927 = shalt.err (!%p924_p1)
}
  0x25   :  { %s1075_s18 = smov 256   ;;  %s1076_s24 = smov 16  }
  0x26   :  { %71 = dma.hbm_to_vmem [thread:$0]  %s1276_s5, 8192, %s66_s13, [#allocation9], %s1075_s18, %s1075_s18, %s1076_s24  }
  0x27   :  { %s928_s12 = scalar_lea.hbm %s1271_s0, 256 }
  0x28   :  { %p929_p2 = scmp.ne.s32.totalorder %s1271_s0, %s928_s12  ;;  %p932_p3 = scmp.lt.u32.totalorder %s928_s12, %s1271_s0 }
  0x2a   :  { %p934_p4 = pnand %p932_p3, %p929_p2 }
  0x2c   :  { %937 = shalt.err (!%p934_p4)
}
  0x2d   :  { %s938_s20 = scalar_lea.vmem %s29_s15, 256  ;;  %p943_p6 = scmp.lt.s32.totalorder %s29_s15, %s29_s15 }
  0x2e   :  { %p939_p5 = scmp.ne.s32.totalorder %s29_s15, %s938_s20  ;;  %p944_p7 = scmp.lt.s32.totalorder %s938_s20, %s938_s20 }
  0x30   :  { %p945_p8 = por %p944_p7, %p943_p6 }
  0x32   :  { %p946_p9 = pnand %p945_p8, %p939_p5 }
  0x34   :  { %949 = shalt.err (!%p946_p9)
}
  0x35   :  { %31 = dma.hbm_to_vmem [thread:$0]  %s1271_s0, 256, %s29_s15, [#allocation3]  }
  0x36   :  { %s1077_s21 = smov [#allocation7]   ;;  %s1078_s23 = smov [#allocation10]  }
  0x37   :  { %s51_s22 = sshll.u32 %s1077_s21, 4  ;;  %s79_s1 = sshll.u32 %s1078_s23, 4  ;;  %s52_s22 = int_to_ptr.vmem [resolvable:$true] %s51_s22  ;;  %s80_s1 = int_to_ptr.vmem [resolvable:$true] %s79_s1 }
  0x38   :  { %s950_s29 = scalar_lea.hbm %s1274_s3, 4096 }
  0x39   :  { %p951_p10 = scmp.ne.s32.totalorder %s1274_s3, %s950_s29  ;;  %p954_p11 = scmp.lt.u32.totalorder %s950_s29, %s1274_s3 }
  0x3b   :  { %p956_p12 = pnand %p954_p11, %p951_p10 }
  0x3d   :  { %959 = shalt.err (!%p956_p12)
}
  0x3e   :  { %s960_s0 = scalar_lea.vmem %s52_s22, 4096  ;;  %p965_p0 = scmp.lt.s32.totalorder %s52_s22, %s52_s22 }
  0x3f   :  { %p961_p13 = scmp.ne.s32.totalorder %s52_s22, %s960_s0  ;;  %p966_p1 = scmp.lt.s32.totalorder %s960_s0, %s960_s0 }
  0x41   :  { %p967_p2 = por %p966_p1, %p965_p0 }
  0x43   :  { %p968_p3 = pnand %p967_p2, %p961_p13 }
  0x45   :  { %971 = shalt.err (!%p968_p3)
}
  0x46   :  { %57 = dma.hbm_to_vmem [thread:$0]  %s1274_s3, 4096, %s52_s22, [#allocation6], %s1075_s18, %s1075_s18, %s1076_s24  }
  0x47   :  { %s972_s5 = scalar_lea.hbm %s1278_s7, 4096 }
  0x48   :  { %p973_p4 = scmp.ne.s32.totalorder %s1278_s7, %s972_s5  ;;  %p976_p5 = scmp.lt.u32.totalorder %s972_s5, %s1278_s7 }
  0x4a   :  { %p978_p6 = pnand %p976_p5, %p973_p4 }
  0x4c   :  { %981 = shalt.err (!%p978_p6)
}
  0x4d   :  { %s982_s26 = scalar_lea.vmem %s80_s1, 4096  ;;  %p987_p8 = scmp.lt.s32.totalorder %s80_s1, %s80_s1 }
  0x4e   :  { %p983_p7 = scmp.ne.s32.totalorder %s80_s1, %s982_s26  ;;  %p988_p9 = scmp.lt.s32.totalorder %s982_s26, %s982_s26 }
  0x50   :  { %p989_p10 = por %p988_p9, %p987_p8 }
  0x52   :  { %p990_p11 = pnand %p989_p10, %p983_p7 }
  0x54   :  { %993 = shalt.err (!%p990_p11)
}
  0x55   :  { %85 = dma.hbm_to_vmem [thread:$0]  %s1278_s7, 4096, %s80_s1, [#allocation9], %s1071_s27, %s1071_s27, %s1072_s28  }
  0x56   :  { %1060 = dma.done.wait [#allocation3], 256  }
  0x57   :  { %1061 = vsyncadd [#allocation3], 4294967040 }
  0x58   :  { %1062 = dma.done.wait [#allocation6], 8192  }
  0x59   :  { %1063 = vsyncadd [#allocation6], 4294959104 }
  0x5a   :  { %1064 = dma.done.wait [#allocation9], 12288  }
  0x5b   :  { %1065 = vsyncadd [#allocation9], 4294955008  ;;  %v121_v0 = vld [vmem:[#allocation5 + $0x80] sm:$0xff]  ;;  %v122_v1 = vld [vmem:[#allocation5 + $0x88] sm:$0xff]  ;;  %s1080_s22 = smov [#allocation12]  }
  0x5c   :  { %v105_v2 = vld [vmem:[#allocation5] sm:$0xff]  ;;  %v711_v3 = vpack.c.bf16 %v122_v1, %v121_v0  ;;  %v106_v4 = vld [vmem:[#allocation5 + $0x8] sm:$0xff]  ;;  %v123_v5 = vld [vmem:[#allocation5 + $0x90] sm:$0xff]  ;;  %s611_s1 = sshll.u32 %s1080_s22, 4  ;;  %s612_s1 = int_to_ptr.vmem [resolvable:$true] %s611_s1 }
  0x5d   :  { %v124_v6 = vld [vmem:[#allocation5 + $0x98] sm:$0xff]  ;;  %v713_v7 = vpack.c.bf16 %v106_v4, %v105_v2  ;;  %v107_v9 = vld [vmem:[#allocation5 + $0x10] sm:$0xff]  ;;  %v125_v11 = vld [vmem:[#allocation5 + $0xa0] sm:$0xff]  ;;  %s994_s29 = scalar_lea.vmem %s612_s1, 256  ;;  %p999_p13 = scmp.lt.s32.totalorder %s612_s1, %s612_s1 }
  0x5e   :  { %v715_v8 = vpack.c.bf16 %v124_v6, %v123_v5  ;;  %v108_v10 = vld [vmem:[#allocation5 + $0x18] sm:$0xff]  ;;  %712 = vmatprep.subr.bf16.mxu0 %v711_v3  ;;  %v126_v12 = vld [vmem:[#allocation5 + $0xa8] sm:$0xff]  ;;  %v109_v15 = vld [vmem:[#allocation5 + $0x20] sm:$0xff]  ;;  %p995_p12 = scmp.ne.s32.totalorder %s612_s1, %s994_s29  ;;  %p1000_p0 = scmp.lt.s32.totalorder %s994_s29, %s994_s29 }
  0x5f   :  { %714 = vmatpush3.bf16.msra.mxu0 %v713_v7  ;;  %v717_v13 = vpack.c.bf16 %v108_v10, %v107_v9  ;;  %v719_v14 = vpack.c.bf16 %v126_v12, %v125_v11  ;;  %v110_v16 = vld [vmem:[#allocation5 + $0x28] sm:$0xff]  ;;  %v127_v17 = vld [vmem:[#allocation5 + $0xb0] sm:$0xff]  ;;  %v128_v18 = vld [vmem:[#allocation5 + $0xb8] sm:$0xff] }
  0x60   :  { %716 = vmatprep.subr.bf16.mxu0 %v715_v8  ;;  %v721_v19 = vpack.c.bf16 %v110_v16, %v109_v15  ;;  %v723_v20 = vpack.c.bf16 %v128_v18, %v127_v17  ;;  %v111_v21 = vld [vmem:[#allocation5 + $0x30] sm:$0xff]  ;;  %v112_v22 = vld [vmem:[#allocation5 + $0x38] sm:$0xff]  ;;  %v129_v23 = vld [vmem:[#allocation5 + $0xc0] sm:$0xff]  ;;  %p1001_p1 = por %p1000_p0, %p999_p13 }
  0x61   :  { %v130_v24 = vld [vmem:[#allocation5 + $0xc8] sm:$0xff]  ;;  %v1215_v25 = vld [vmem:[#allocation2 + $0x8] sm:$0xff]  ;;  %v113_v26 = vld [vmem:[#allocation5 + $0x40] sm:$0xff]  ;;  %v725_v30 = vpack.c.bf16 %v112_v22, %v111_v21 }
  0x62   :  { %v114_v27 = vld [vmem:[#allocation5 + $0x48] sm:$0xff]  ;;  %208 = vmatprep.mubr.f32.mxu0 %v1215_v25  ;;  %v218_v29 = vld [vmem:[#allocation7 + $0x18] sm:$0xff]  ;;  %v131_v31 = vld [vmem:[#allocation5 + $0xd0] sm:$0xff]  ;;  %v727_v36 = vpack.c.bf16 %v130_v24, %v129_v23  ;;  %p1002_p2 = pnand %p1001_p1, %p995_p12 }
  0x63   :  { %718 = vmatpush3.bf16.msra.mxu0 %v717_v13  ;;  %v216_v28 = vld [vmem:[#allocation7 + $0x8] sm:$0xff]  ;;  %v215_v33 = vld [vmem:[#allocation7] sm:$0xff]  ;;  %v217_v34 = vld [vmem:[#allocation7 + $0x10] sm:$0xff]  ;;  %v729_v46 = vpack.c.bf16 %v114_v27, %v113_v26 }
  0x64   :  { %720 = vmatprep.subr.bf16.mxu0 %v719_v14  ;;  %v743_v32 = vpack.c.bf16 %v218_v29, %v216_v28  ;;  %v220_v35 = vld [vmem:[#allocation7 + $0x28] sm:$0xff]  ;;  %v745_v37 = vpack.c.bf16 %v217_v34, %v215_v33  ;;  %v222_v38 = vld [vmem:[#allocation7 + $0x38] sm:$0xff]  ;;  %v219_v39 = vld [vmem:[#allocation7 + $0x20] sm:$0xff] }
  0x65   :  { %v221_v40 = vld [vmem:[#allocation7 + $0x30] sm:$0xff]  ;;  %v132_v41 = vld [vmem:[#allocation5 + $0xd8] sm:$0xff]  ;;  %v747_v42 = vpack.c.bf16 %v222_v38, %v220_v35  ;;  %v224_v43 = vld [vmem:[#allocation7 + $0x48] sm:$0xff]  ;;  %v1079_v35 = vmov 0.0  }
  0x66   :  { %744 = vmatprep.subr.bf16.mxu1 %v743_v32  ;;  %v226_v44 = vld [vmem:[#allocation7 + $0x58] sm:$0xff]  ;;  %v749_v45 = vpack.c.bf16 %v221_v40, %v219_v39  ;;  %v115_v47 = vld [vmem:[#allocation5 + $0x50] sm:$0xff]  ;;  %v223_v49 = vld [vmem:[#allocation7 + $0x40] sm:$0xff]  ;;  %v731_v51 = vpack.c.bf16 %v132_v41, %v131_v31  ;;  %323 = vmatprep.mubr.f32.mxu1 %v1079_v35 }
  0x67   :  { %722 = vmatpush3.bf16.msra.mxu0 %v721_v19  ;;  %746 = vmatpush1.bf16.msra.mxu1 %v745_v37  ;;  %v751_v48 = vpack.c.bf16 %v226_v44, %v224_v43  ;;  %v225_v50 = vld [vmem:[#allocation7 + $0x50] sm:$0xff]  ;;  %v116_v52 = vld [vmem:[#allocation5 + $0x58] sm:$0xff]  ;;  %v228_v53 = vld [vmem:[#allocation7 + $0x68] sm:$0xff] }
  0x68   :  { %724 = vmatprep.subr.bf16.mxu0 %v723_v20  ;;  %748 = vmatprep.subr.bf16.mxu1 %v747_v42  ;;  %v230_v54 = vld [vmem:[#allocation7 + $0x78] sm:$0xff]  ;;  %v133_v55 = vld [vmem:[#allocation5 + $0xe0] sm:$0xff]  ;;  %v134_v56 = vld [vmem:[#allocation5 + $0xe8] sm:$0xff]  ;;  %v753_v57 = vpack.c.bf16 %v225_v50, %v223_v49  ;;  %v733_v58 = vpack.c.bf16 %v116_v52, %v115_v47 }
  0x69   :  { %v117_v59 = vld [vmem:[#allocation5 + $0x60] sm:$0xff]  ;;  %v755_v60 = vpack.c.bf16 %v230_v54, %v228_v53  ;;  %v229_v62 = vld [vmem:[#allocation7 + $0x70] sm:$0xff]  ;;  %v735_v63 = vpack.c.bf16 %v134_v56, %v133_v55  ;;  %v118_v0 = vld [vmem:[#allocation5 + $0x68] sm:$0xff] }
  0x6a   :  { %v227_v61 = vld [vmem:[#allocation7 + $0x60] sm:$0xff]  ;;  %v232_v1 = vld [vmem:[#allocation7 + $0x88] sm:$0xff]  ;;  %v234_v2 = vld [vmem:[#allocation7 + $0x98] sm:$0xff]  ;;  %v737_v6 = vpack.c.bf16 %v118_v0, %v117_v59 }
  0x6b   :  { %726 = vmatpush3.bf16.msra.mxu0 %v725_v30  ;;  %750 = vmatpush1.bf16.msra.mxu1 %v749_v45  ;;  %v135_v3 = vld [vmem:[#allocation5 + $0xf0] sm:$0xff]  ;;  %v136_v4 = vld [vmem:[#allocation5 + $0xf8] sm:$0xff]  ;;  %v757_v5 = vpack.c.bf16 %v229_v62, %v227_v61  ;;  %v759_v8 = vpack.c.bf16 %v234_v2, %v232_v1  ;;  %v231_v9 = vld [vmem:[#allocation7 + $0x80] sm:$0xff] }
  0x6c   :  { %728 = vmatprep.subr.bf16.mxu0 %v727_v36  ;;  %752 = vmatprep.subr.bf16.mxu1 %v751_v48  ;;  %v119_v7 = vld [vmem:[#allocation5 + $0x70] sm:$0xff]  ;;  %v739_v11 = vpack.c.bf16 %v136_v4, %v135_v3  ;;  %v120_v12 = vld [vmem:[#allocation5 + $0x78] sm:$0xff]  ;;  %v236_v13 = vld [vmem:[#allocation7 + $0xa8] sm:$0xff] }
  0x6d   :  { %v233_v10 = vld [vmem:[#allocation7 + $0x90] sm:$0xff]  ;;  %v238_v14 = vld [vmem:[#allocation7 + $0xb8] sm:$0xff]  ;;  %v741_v16 = vpack.c.bf16 %v120_v12, %v119_v7  ;;  %v235_v18 = vld [vmem:[#allocation7 + $0xa0] sm:$0xff] }
  0x6e   :  { %v761_v15 = vpack.c.bf16 %v233_v10, %v231_v9  ;;  %v763_v17 = vpack.c.bf16 %v238_v14, %v236_v13  ;;  %v237_v19 = vld [vmem:[#allocation7 + $0xb0] sm:$0xff]  ;;  %v240_v22 = vld [vmem:[#allocation7 + $0xc8] sm:$0xff]  ;;  %v242_v23 = vld [vmem:[#allocation7 + $0xd8] sm:$0xff] }
  0x6f   :  { %730 = vmatpush3.bf16.msra.mxu0 %v729_v46  ;;  %754 = vmatpush1.bf16.msra.mxu1 %v753_v57  ;;  %v765_v20 = vpack.c.bf16 %v237_v19, %v235_v18  ;;  %v1218_v21 = vld [vmem:[#allocation2] sm:$0xff]  ;;  %v767_v24 = vpack.c.bf16 %v242_v23, %v240_v22  ;;  %v239_v26 = vld [vmem:[#allocation7 + $0xc0] sm:$0xff]  ;;  %v244_v29 = vld [vmem:[#allocation7 + $0xe8] sm:$0xff] }
  0x70   :  { %732 = vmatprep.subr.bf16.mxu0 %v731_v51  ;;  %756 = vmatprep.subr.bf16.mxu1 %v755_v60  ;;  %v241_v27 = vld [vmem:[#allocation7 + $0xd0] sm:$0xff]  ;;  %v246_v30 = vld [vmem:[#allocation7 + $0xf8] sm:$0xff]  ;;  %v243_v32 = vld [vmem:[#allocation7 + $0xe0] sm:$0xff] }
  0x71   :  { %v769_v28 = vpack.c.bf16 %v241_v27, %v239_v26  ;;  %v771_v31 = vpack.c.bf16 %v246_v30, %v244_v29  ;;  %v245_v33 = vld [vmem:[#allocation7 + $0xf0] sm:$0xff]  ;;  %v333_v36 = vld [vmem:[#allocation8 + $0x8] sm:$0xff]  ;;  %v335_v37 = vld [vmem:[#allocation8 + $0x18] sm:$0xff] }
  0x72   :  { %v773_v34 = vpack.c.bf16 %v245_v33, %v243_v32  ;;  %v332_v38 = vld [vmem:[#allocation8] sm:$0xff]  ;;  %v775_v39 = vpack.c.bf16 %v335_v37, %v333_v36  ;;  %v334_v40 = vld [vmem:[#allocation8 + $0x10] sm:$0xff]  ;;  %v337_v41 = vld [vmem:[#allocation8 + $0x28] sm:$0xff] }
  0x73   :  { %734 = vmatpush3.bf16.msra.mxu0 %v733_v58  ;;  %758 = vmatpush1.bf16.msra.mxu1 %v757_v5  ;;  %v339_v42 = vld [vmem:[#allocation8 + $0x38] sm:$0xff]  ;;  %v777_v43 = vpack.c.bf16 %v334_v40, %v332_v38  ;;  %v336_v45 = vld [vmem:[#allocation8 + $0x20] sm:$0xff]  ;;  %v338_v46 = vld [vmem:[#allocation8 + $0x30] sm:$0xff] }
  0x74   :  { %736 = vmatprep.subr.bf16.mxu0 %v735_v63  ;;  %760 = vmatprep.subr.bf16.mxu1 %v759_v8  ;;  %v779_v44 = vpack.c.bf16 %v339_v42, %v337_v41  ;;  %v341_v47 = vld [vmem:[#allocation8 + $0x48] sm:$0xff]  ;;  %v343_v48 = vld [vmem:[#allocation8 + $0x58] sm:$0xff]  ;;  %v781_v49 = vpack.c.bf16 %v338_v46, %v336_v45  ;;  %v340_v51 = vld [vmem:[#allocation8 + $0x40] sm:$0xff] }
  0x75   :  { %v783_v50 = vpack.c.bf16 %v343_v48, %v341_v47  ;;  %v342_v52 = vld [vmem:[#allocation8 + $0x50] sm:$0xff]  ;;  %v345_v53 = vld [vmem:[#allocation8 + $0x68] sm:$0xff]  ;;  %v347_v54 = vld [vmem:[#allocation8 + $0x78] sm:$0xff] }
  0x76   :  { %v785_v55 = vpack.c.bf16 %v342_v52, %v340_v51  ;;  %v787_v56 = vpack.c.bf16 %v347_v54, %v345_v53  ;;  %v344_v57 = vld [vmem:[#allocation8 + $0x60] sm:$0xff]  ;;  %v346_v58 = vld [vmem:[#allocation8 + $0x70] sm:$0xff]  ;;  %v349_v59 = vld [vmem:[#allocation8 + $0x88] sm:$0xff] }
  0x77   :  { %738 = vmatpush3.bf16.msra.mxu0 %v737_v6  ;;  %762 = vmatpush1.bf16.msra.mxu1 %v761_v15  ;;  %v351_v60 = vld [vmem:[#allocation8 + $0x98] sm:$0xff]  ;;  %v789_v61 = vpack.c.bf16 %v346_v58, %v344_v57  ;;  %v348_v63 = vld [vmem:[#allocation8 + $0x80] sm:$0xff]  ;;  %v350_v0 = vld [vmem:[#allocation8 + $0x90] sm:$0xff] }
  0x78   :  { %740 = vmatprep.subr.bf16.mxu0 %v739_v11  ;;  %764 = vmatprep.subr.bf16.mxu1 %v763_v17  ;;  %v791_v62 = vpack.c.bf16 %v351_v60, %v349_v59  ;;  %v353_v1 = vld [vmem:[#allocation8 + $0xa8] sm:$0xff]  ;;  %v355_v2 = vld [vmem:[#allocation8 + $0xb8] sm:$0xff]  ;;  %v793_v3 = vpack.c.bf16 %v350_v0, %v348_v63  ;;  %v352_v5 = vld [vmem:[#allocation8 + $0xa0] sm:$0xff] }
  0x79   :  { %v795_v4 = vpack.c.bf16 %v355_v2, %v353_v1  ;;  %v354_v6 = vld [vmem:[#allocation8 + $0xb0] sm:$0xff]  ;;  %v357_v7 = vld [vmem:[#allocation8 + $0xc8] sm:$0xff]  ;;  %v359_v8 = vld [vmem:[#allocation8 + $0xd8] sm:$0xff] }
  0x7a   :  { %v797_v9 = vpack.c.bf16 %v354_v6, %v352_v5  ;;  %v799_v10 = vpack.c.bf16 %v359_v8, %v357_v7  ;;  %v356_v11 = vld [vmem:[#allocation8 + $0xc0] sm:$0xff]  ;;  %v358_v12 = vld [vmem:[#allocation8 + $0xd0] sm:$0xff]  ;;  %v361_v13 = vld [vmem:[#allocation8 + $0xe8] sm:$0xff] }
  0x7b   :  { %742 = vmatpush3.bf16.msra.mxu0 %v741_v16  ;;  %766 = vmatpush1.bf16.msra.mxu1 %v765_v20  ;;  %v363_v14 = vld [vmem:[#allocation8 + $0xf8] sm:$0xff]  ;;  %v801_v15 = vpack.c.bf16 %v358_v12, %v356_v11  ;;  %v360_v17 = vld [vmem:[#allocation8 + $0xe0] sm:$0xff]  ;;  %v362_v18 = vld [vmem:[#allocation8 + $0xf0] sm:$0xff] }
  0x7c   :  { %768 = vmatprep.subr.bf16.mxu1 %v767_v24  ;;  %776 = vmatprep.subr.bf16.mxu0 %v775_v39  ;;  %v803_v16 = vpack.c.bf16 %v363_v14, %v361_v13  ;;  %v365_v19 = vld [vmem:[#allocation8 + $0x108] sm:$0xff]  ;;  %v367_v20 = vld [vmem:[#allocation8 + $0x118] sm:$0xff]  ;;  %v805_v22 = vpack.c.bf16 %v362_v18, %v360_v17  ;;  %v364_v24 = vld [vmem:[#allocation8 + $0x100] sm:$0xff] }
  0x7d   :  { %v807_v23 = vpack.c.bf16 %v367_v20, %v365_v19  ;;  %v366_v26 = vld [vmem:[#allocation8 + $0x110] sm:$0xff]  ;;  %v369_v27 = vld [vmem:[#allocation8 + $0x128] sm:$0xff]  ;;  %v372_v37 = vld [vmem:[#allocation8 + $0x140] sm:$0xff] }
  0x7e   :  { %209 = vmatmul.mubr.f32.vlgmr.msra.gmra.mrb[0].mxu0 %v1218_v21  ;;  %v809_v29 = vpack.c.bf16 %v366_v26, %v364_v24  ;;  %v370_v32 = vld [vmem:[#allocation8 + $0x130] sm:$0xff]  ;;  %v373_v33 = vld [vmem:[#allocation8 + $0x148] sm:$0xff]  ;;  %v379_v40 = vld [vmem:[#allocation8 + $0x178] sm:$0xff] }
  0x7f   :  { %770 = vmatpush1.bf16.msra.mxu1 %v769_v28  ;;  %778 = vmatpush1.bf16.msra.mxu0 %v777_v43  ;;  %v371_v28 = vld [vmem:[#allocation8 + $0x138] sm:$0xff]  ;;  %v374_v38 = vld [vmem:[#allocation8 + $0x150] sm:$0xff]  ;;  %v377_v39 = vld [vmem:[#allocation8 + $0x168] sm:$0xff] }
  0x80   :  { %772 = vmatprep.subr.bf16.mxu1 %v771_v31  ;;  %780 = vmatprep.subr.bf16.mxu0 %v779_v44  ;;  %v811_v30 = vpack.c.bf16 %v371_v28, %v369_v27  ;;  %v368_v31 = vld [vmem:[#allocation8 + $0x120] sm:$0xff]  ;;  %v817_v41 = vpack.c.bf16 %v374_v38, %v372_v37  ;;  %v819_v42 = vpack.c.bf16 %v379_v40, %v377_v39  ;;  %v378_v44 = vld [vmem:[#allocation8 + $0x170] sm:$0xff]  ;;  %v381_v45 = vld [vmem:[#allocation8 + $0x188] sm:$0xff] }
  0x81   :  { %v813_v35 = vpack.c.bf16 %v370_v32, %v368_v31  ;;  %v376_v43 = vld [vmem:[#allocation8 + $0x160] sm:$0xff]  ;;  %v383_v46 = vld [vmem:[#allocation8 + $0x198] sm:$0xff]  ;;  %v385_v51 = vld [vmem:[#allocation8 + $0x1a8] sm:$0xff] }
  0x82   :  { %v821_v47 = vpack.c.bf16 %v378_v44, %v376_v43  ;;  %v823_v48 = vpack.c.bf16 %v383_v46, %v381_v45  ;;  %v387_v52 = vld [vmem:[#allocation8 + $0x1b8] sm:$0xff]  ;;  %v389_v57 = vld [vmem:[#allocation8 + $0x1c8] sm:$0xff]  ;;  %v497_v12 = vld [vmem:[#allocation10 + $0x80] sm:$0xff] }
  0x83   :  { %774 = vmatpush1.bf16.msra.mxu1 %v773_v34  ;;  %782 = vmatpush1.bf16.msra.mxu0 %v781_v49  ;;  %v375_v34 = vld [vmem:[#allocation8 + $0x158] sm:$0xff]  ;;  %v380_v49 = vld [vmem:[#allocation8 + $0x180] sm:$0xff]  ;;  %v827_v54 = vpack.c.bf16 %v387_v52, %v385_v51  ;;  %v393_v6 = vld [vmem:[#allocation8 + $0x1e8] sm:$0xff] }
  0x84   :  { %784 = vmatprep.subr.bf16.mxu0 %v783_v50  ;;  %v815_v36 = vpack.c.bf16 %v375_v34, %v373_v33  ;;  %v382_v50 = vld [vmem:[#allocation8 + $0x190] sm:$0xff]  ;;  %v391_v58 = vld [vmem:[#allocation8 + $0x1d8] sm:$0xff]  ;;  %v498_v13 = vld [vmem:[#allocation10 + $0x88] sm:$0xff] }
  0x85   :  { %v825_v53 = vpack.c.bf16 %v382_v50, %v380_v49  ;;  %v831_v60 = vpack.c.bf16 %v391_v58, %v389_v57  ;;  %v395_v7 = vld [vmem:[#allocation8 + $0x1f8] sm:$0xff]  ;;  %v481_v14 = vld [vmem:[#allocation10] sm:$0xff]  ;;  %v499_v17 = vld [vmem:[#allocation10 + $0x90] sm:$0xff] }
  0x86   :  { %v835_v8 = vpack.c.bf16 %v395_v7, %v393_v6  ;;  %v500_v18 = vld [vmem:[#allocation10 + $0x98] sm:$0xff]  ;;  %v501_v24 = vld [vmem:[#allocation10 + $0xa0] sm:$0xff]  ;;  %v502_v26 = vld [vmem:[#allocation10 + $0xa8] sm:$0xff] }
  0x87   :  { %786 = vmatpush1.bf16.msra.mxu0 %v785_v55  ;;  %v384_v55 = vld [vmem:[#allocation8 + $0x1a0] sm:$0xff]  ;;  %v843_v20 = vpack.c.bf16 %v500_v18, %v499_v17  ;;  %v847_v28 = vpack.c.bf16 %v502_v26, %v501_v24  ;;  %v503_v31 = vld [vmem:[#allocation10 + $0xb0] sm:$0xff]  ;;  %v504_v32 = vld [vmem:[#allocation10 + $0xb8] sm:$0xff] }
  0x88   :  { %788 = vmatprep.subr.bf16.mxu0 %v787_v56  ;;  %v386_v56 = vld [vmem:[#allocation8 + $0x1b0] sm:$0xff]  ;;  %v851_v34 = vpack.c.bf16 %v504_v32, %v503_v31  ;;  %v505_v37 = vld [vmem:[#allocation10 + $0xc0] sm:$0xff]  ;;  %v506_v38 = vld [vmem:[#allocation10 + $0xc8] sm:$0xff] }
  0x89   :  { %v829_v59 = vpack.c.bf16 %v386_v56, %v384_v55  ;;  %v855_v40 = vpack.c.bf16 %v506_v38, %v505_v37  ;;  %v507_v43 = vld [vmem:[#allocation10 + $0xd0] sm:$0xff]  ;;  %v508_v44 = vld [vmem:[#allocation10 + $0xd8] sm:$0xff]  ;;  %v509_v49 = vld [vmem:[#allocation10 + $0xe0] sm:$0xff] }
  0x8a   :  { %v859_v46 = vpack.c.bf16 %v508_v44, %v507_v43  ;;  %v510_v50 = vld [vmem:[#allocation10 + $0xe8] sm:$0xff]  ;;  %v247_v56 = vld [vmem:[%s1275_s4] sm:$0x3]  ;;  %v512_v6 = vld [vmem:[#allocation10 + $0xf8] sm:$0xff] }
  0x8b   :  { %790 = vmatpush1.bf16.msra.mxu0 %v789_v61  ;;  %v863_v52 = vpack.c.bf16 %v510_v50, %v509_v49 }
  0x8c   :  { %792 = vmatprep.subr.bf16.mxu0 %v791_v62  ;;  %v639_v62 = vld [vmem:[%s1273_s2] ss:$0 sm:$0xff] }
  0x8f   :  { %794 = vmatpush1.bf16.msra.mxu0 %v793_v3  ;;  %v388_v3 = vld [vmem:[#allocation8 + $0x1c0] sm:$0xff] }
  0x90   :  { %796 = vmatprep.subr.bf16.mxu0 %v795_v4  ;;  %v390_v4 = vld [vmem:[#allocation8 + $0x1d0] sm:$0xff] }
  0x91   :  { %v833_v5 = vpack.c.bf16 %v390_v4, %v388_v3  ;;  %v494_v3 = vld [vmem:[#allocation10 + $0x68] sm:$0xff] }
  0x93   :  { %798 = vmatpush1.bf16.msra.mxu0 %v797_v9  ;;  %v392_v9 = vld [vmem:[#allocation8 + $0x1e0] sm:$0xff] }
  0x94   :  { %800 = vmatprep.subr.bf16.mxu0 %v799_v10  ;;  %v394_v10 = vld [vmem:[#allocation8 + $0x1f0] sm:$0xff] }
  0x95   :  { %v837_v11 = vpack.c.bf16 %v394_v10, %v392_v9  ;;  %v496_v9 = vld [vmem:[#allocation10 + $0x78] sm:$0xff] }
  0x97   :  { %802 = vmatpush1.bf16.msra.mxu0 %v801_v15  ;;  %v839_v15 = vpack.c.bf16 %v498_v13, %v497_v12 }
  0x98   :  { %804 = vmatprep.subr.bf16.mxu0 %v803_v16  ;;  %v482_v16 = vld [vmem:[#allocation10 + $0x8] sm:$0xff] }
  0x99   :  { %v841_v19 = vpack.c.bf16 %v482_v16, %v481_v14  ;;  %840 = vmatprep.subr.bf16.mxu1 %v839_v15 }
  0x9b   :  { %806 = vmatpush1.bf16.msra.mxu0 %v805_v22  ;;  %v483_v22 = vld [vmem:[#allocation10 + $0x10] sm:$0xff] }
  0x9c   :  { %808 = vmatprep.subr.bf16.mxu0 %v807_v23  ;;  %v484_v23 = vld [vmem:[#allocation10 + $0x18] sm:$0xff] }
  0x9d   :  { %v845_v27 = vpack.c.bf16 %v484_v23, %v483_v22 }
  0x9f   :  { %810 = vmatpush1.bf16.msra.mxu0 %v809_v29  ;;  %v485_v29 = vld [vmem:[#allocation10 + $0x20] sm:$0xff] }
  0xa0   :  { %812 = vmatprep.subr.bf16.mxu0 %v811_v30  ;;  %v486_v30 = vld [vmem:[#allocation10 + $0x28] sm:$0xff] }
  0xa1   :  { %v849_v33 = vpack.c.bf16 %v486_v30, %v485_v29 }
  0xa3   :  { %814 = vmatpush1.bf16.msra.mxu0 %v813_v35  ;;  %v487_v35 = vld [vmem:[#allocation10 + $0x30] sm:$0xff] }
  0xa4   :  { %816 = vmatprep.subr.bf16.mxu0 %v815_v36  ;;  %v488_v36 = vld [vmem:[#allocation10 + $0x38] sm:$0xff] }
  0xa5   :  { %v853_v39 = vpack.c.bf16 %v488_v36, %v487_v35 }
  0xa7   :  { %818 = vmatpush1.bf16.msra.mxu0 %v817_v41  ;;  %v489_v41 = vld [vmem:[#allocation10 + $0x40] sm:$0xff] }
  0xa8   :  { %820 = vmatprep.subr.bf16.mxu0 %v819_v42  ;;  %v490_v42 = vld [vmem:[#allocation10 + $0x48] sm:$0xff] }
  0xa9   :  { %v857_v45 = vpack.c.bf16 %v490_v42, %v489_v41 }
  0xab   :  { %822 = vmatpush1.bf16.msra.mxu0 %v821_v47  ;;  %v491_v47 = vld [vmem:[#allocation10 + $0x50] sm:$0xff] }
  0xac   :  { %824 = vmatprep.subr.bf16.mxu0 %v823_v48  ;;  %v492_v48 = vld [vmem:[#allocation10 + $0x58] sm:$0xff] }
  0xad   :  { %v861_v51 = vpack.c.bf16 %v492_v48, %v491_v47 }
  0xaf   :  { %826 = vmatpush1.bf16.msra.mxu0 %v825_v53  ;;  %v249_v53 = vlaneseq }
  0xb0   :  { %828 = vmatprep.subr.bf16.mxu0 %v827_v54 }
  0xb1   :  { %v250_v54 = vshrl.u32 %v249_v53, 7 }
  0xb3   :  { %830 = vmatpush1.bf16.msra.mxu0 %v829_v59  ;;  %v251_v55 = vsub.s32 0, %v250_v54  ;;  %v255_v57 = vsub.s32 1, %v250_v54 }
  0xb4   :  { %832 = vmatprep.subr.bf16.mxu0 %v831_v60 }
  0xb5   :  { %v252_v58 = vrot.slane %v247_v56, %v251_v55  ;;  %v256_v59 = vrot.slane %v247_v56, %v255_v57 }
  0xb7   :  { %834 = vmatpush1.bf16.msra.mxu0 %v833_v5  ;;  %v511_v5 = vld [vmem:[#allocation10 + $0xf0] sm:$0xff] }
  0xb8   :  { %836 = vmatprep.subr.bf16.mxu0 %v835_v8  ;;  %v867_v7 = vpack.c.bf16 %v512_v6, %v511_v5  ;;  %v495_v8 = vld [vmem:[#allocation10 + $0x70] sm:$0xff] }
  0xb9   :  { %v869_v10 = vpack.c.bf16 %v496_v9, %v495_v8 }
  0xbb   :  { %838 = vmatpush1.bf16.msra.mxu0 %v837_v11 }
 0x151   :  { %v673_v61 = vpop.f32.mrb[0].mxu0 }
 0x152   :  { %v674_v63 = vpop.f32.mrb[1].mxu0 }
 0x153   :  { %v675_v0 = vadd.f32 %v674_v63, %v673_v61 }
 0x155   :  { %v211_v1 = vadd.f32 %v675_v0, %v639_v62 }
 0x157   :  { %v214_v2 = vmax.f32 %v211_v1, 0.0 }
 0x159   :  { %324 = vmatmul.mubr.f32.vlgmr.msra.gmra.mrb[0].mxu1 %v214_v2  ;;  %v493_v2 = vld [vmem:[#allocation10 + $0x60] sm:$0xff] }
 0x15a   :  { %842 = vmatpush3.bf16.msra.mxu1 %v841_v19  ;;  %v865_v4 = vpack.c.bf16 %v494_v3, %v493_v2 }
 0x15b   :  { %844 = vmatprep.subr.bf16.mxu1 %v843_v20 }
 0x15e   :  { %846 = vmatpush3.bf16.msra.mxu1 %v845_v27 }
 0x15f   :  { %848 = vmatprep.subr.bf16.mxu1 %v847_v28 }
 0x162   :  { %850 = vmatpush3.bf16.msra.mxu1 %v849_v33 }
 0x163   :  { %852 = vmatprep.subr.bf16.mxu1 %v851_v34 }
 0x166   :  { %854 = vmatpush3.bf16.msra.mxu1 %v853_v39 }
 0x167   :  { %856 = vmatprep.subr.bf16.mxu1 %v855_v40 }
 0x16a   :  { %858 = vmatpush3.bf16.msra.mxu1 %v857_v45 }
 0x16b   :  { %860 = vmatprep.subr.bf16.mxu1 %v859_v46 }
 0x16e   :  { %862 = vmatpush3.bf16.msra.mxu1 %v861_v51 }
 0x16f   :  { %864 = vmatprep.subr.bf16.mxu1 %v863_v52 }
 0x172   :  { %866 = vmatpush3.bf16.msra.mxu1 %v865_v4 }
 0x173   :  { %868 = vmatprep.subr.bf16.mxu1 %v867_v7 }
 0x176   :  { %870 = vmatpush3.bf16.msra.mxu1 %v869_v10 }
 0x22c   :  { %v325_v60 = vpop.f32.mrb[0].mxu1 }
 0x22d   :  { %v326_v61 = vadd.f32 %v325_v60, %v252_v58  ;;  %v327_v62 = vpop.f32.mrb[1].mxu1 }
 0x22e   :  { %v328_v63 = vadd.f32 %v327_v62, %v256_v59 }
 0x22f   :  { %v330_v0 = vadd.f32 %v326_v61, %v1218_v21  ;;  %593 = vst [vmem:[#allocation14] sm:$0xff] %v326_v61 }
 0x230   :  { %v331_v1 = vadd.f32 %v328_v63, %v1215_v25  ;;  %594 = vst [vmem:[#allocation14 + $0x8] sm:$0xff] %v328_v63  ;;  %v396_v25 = vld [vmem:[%s1277_s6] sm:$0x3] }
 0x231   :  { %591 = vst [vmem:[#allocation12] sm:$0xff] %v330_v0  ;;  %v401_v21 = vrot.slane %v396_v25, %v251_v55  ;;  %v405_v11 = vrot.slane %v396_v25, %v255_v57 }
 0x232   :  { %592 = vst [vmem:[#allocation12 + $0x8] sm:$0xff] %v331_v1  ;;  %472 = vmatprep.mubr.f32.mxu0 %v331_v1 }
 0x233   :  { %473 = vmatmul.mubr.f32.vlgmr.msra.gmra.mrb[2].mxu0 %v330_v0 }
 0x306   :  { %v474_v12 = vpop.f32.mrb[2].mxu0 }
 0x307   :  { %v475_v13 = vadd.f32 %v474_v12, %v401_v21  ;;  %v476_v14 = vpop.f32.mrb[3].mxu0 }
 0x308   :  { %v477_v15 = vadd.f32 %v476_v14, %v405_v11 }
 0x309   :  { %v479_v17 = vmax.f32 %v475_v13, 0.0 }
 0x30a   :  { %v480_v16 = vmax.f32 %v477_v15, 0.0 }
 0x30c   :  { %584 = vmatprep.mubr.f32.mxu1 %v480_v16 }
 0x30d   :  { %585 = vmatmul.mubr.f32.vlgmr.msra.gmra.mrb[2].mxu1 %v479_v17 }
 0x30e   :  { %1005 = shalt.err (!%p1002_p2)
}
 0x30f   :  { %s1006_s12 = scalar_lea.hbm %s1281_s10, 256 }
 0x310   :  { %p1007_p3 = scmp.ne.s32.totalorder %s1281_s10, %s1006_s12  ;;  %p1010_p4 = scmp.lt.u32.totalorder %s1006_s12, %s1281_s10 }
 0x312   :  { %p1012_p5 = pnand %p1010_p4, %p1007_p3 }
 0x314   :  { %1015 = shalt.err (!%p1012_p5)
}
 0x315   :  { %614 = dma.vmem_to_hbm [thread:$0]  %s612_s1, 256, %s1281_s10, [#allocation13]  }
 0x316   :  { %s1081_s20 = smov [#allocation14]  }
 0x317   :  { %s621_s5 = sshll.u32 %s1081_s20, 4  ;;  %s622_s5 = int_to_ptr.vmem [resolvable:$true] %s621_s5 }
 0x318   :  { %s1016_s13 = scalar_lea.vmem %s622_s5, 256  ;;  %p1021_p7 = scmp.lt.s32.totalorder %s622_s5, %s622_s5 }
 0x319   :  { %p1017_p6 = scmp.ne.s32.totalorder %s622_s5, %s1016_s13  ;;  %p1022_p8 = scmp.lt.s32.totalorder %s1016_s13, %s1016_s13 }
 0x31b   :  { %p1023_p9 = por %p1022_p8, %p1021_p7 }
 0x31d   :  { %p1024_p10 = pnand %p1023_p9, %p1017_p6 }
 0x31f   :  { %1027 = shalt.err (!%p1024_p10)
}
 0x320   :  { %s1028_s25 = scalar_lea.hbm %s1282_s11, 256 }
 0x321   :  { %p1029_p11 = scmp.ne.s32.totalorder %s1282_s11, %s1028_s25  ;;  %p1032_p12 = scmp.lt.u32.totalorder %s1028_s25, %s1282_s11 }
 0x323   :  { %p1034_p13 = pnand %p1032_p12, %p1029_p11 }
 0x325   :  { %1037 = shalt.err (!%p1034_p13)
}
 0x326   :  { %624 = dma.vmem_to_hbm [thread:$0]  %s622_s5, 256, %s1282_s11, [#allocation13]   ;;  %v640_v19 = vld [vmem:[%s1279_s8] ss:$0 sm:$0xff] }
 0x327   :  { %s1082_s4 = smov [#allocation11]  }
 0x328   :  { %s601_s24 = sshll.u32 %s1082_s4, 4  ;;  %s602_s24 = int_to_ptr.vmem [resolvable:$true] %s601_s24 }
 0x329   :  { %s1038_s22 = scalar_lea.vmem %s602_s24, 128  ;;  %p1043_p1 = scmp.lt.s32.totalorder %s602_s24, %s602_s24 }
 0x32a   :  { %p1039_p0 = scmp.ne.s32.totalorder %s602_s24, %s1038_s22  ;;  %p1044_p2 = scmp.lt.s32.totalorder %s1038_s22, %s1038_s22 }
 0x32c   :  { %p1045_p3 = por %p1044_p2, %p1043_p1 }
 0x32e   :  { %p1046_p4 = pnand %p1045_p3, %p1039_p0 }
 0x3e0   :  { %v708_v18 = vpop.f32.mrb[2].mxu1 }
 0x3e1   :  { %v709_v20 = vpop.f32.mrb[3].mxu1 }
 0x3e2   :  { %v710_v22 = vadd.f32 %v709_v20, %v708_v18 }
 0x3e4   :  { %v587_v23 = vadd.f32 %v710_v22, %v640_v19 }
 0x3e6   :  { %590 = vst [vmem:[#allocation11] sm:$0xff] %v587_v23 }
 0x3e7   :  { %1049 = shalt.err (!%p1046_p4)
}
 0x3e8   :  { %s1050_s29 = scalar_lea.hbm %s1280_s9, 128 }
 0x3e9   :  { %p1051_p5 = scmp.ne.s32.totalorder %s1280_s9, %s1050_s29  ;;  %p1054_p6 = scmp.lt.u32.totalorder %s1050_s29, %s1280_s9 }
 0x3eb   :  { %p1056_p7 = pnand %p1054_p6, %p1051_p5 }
 0x3ed   :  { %1059 = shalt.err (!%p1056_p7)
}
 0x3ee   :  { %604 = dma.vmem_to_hbm [thread:$0]  %s602_s24, 128, %s1280_s9, [#allocation4]  }
 0x3ef   :  { %1066 = dma.done.wait [#allocation4], 128  }
 0x3f0   :  { %1067 = vsyncadd [#allocation4], 4294967168 }
 0x3f1   :  { %1068 = dma.done.wait [#allocation13], 512  }
 0x3f2   :  { %1069 = vsyncadd [#allocation13], 4294966784 }
 0x3f3   :  { %634 = vsyncpa [#allocation3], 1 }
 0x3f4   :  { %635 = vsyncpa [#allocation6], 1 }
 0x3f5   :  { %636 = vsyncpa [#allocation9], 1 }
 0x3f6   :  { %637 = vsyncpa [#allocation4], 1 }
 0x3f7   :  { %638 = vsyncpa [#allocation13], 1 }

</bundles_post_ra>
